<compile_context>
chip_gen: v6e
topology: v6e:2x2x1
jax: 0.10.0
libtpu: 0.0.40
codegen_flags: <defaults>
</compile_context>

<pallas_src>
import functools

import jax
import jax.numpy as jnp
from jax.experimental import pallas as pl
from jax.experimental.pallas import tpu as pltpu


# ----------------------------------------------------------------------------
# Fused Conv2d + (folded) BatchNorm2d + ReLU kernel (one image per grid step)
# ----------------------------------------------------------------------------
def _cbr_kernel(x_ref, w_ref, b_ref, o_ref, *, kh, kw, stride, dilation, ho, wo):
    # x_ref: [Hp, Wp, Cin]      bf16  (NHWC, spatially pre-padded, batch squeezed)
    # w_ref: [KH*KW, Cin, Cout] bf16  (BN scale already folded in)
    # b_ref: [1, Cout]          f32   (BN shift; conv bias=False in the module)
    # o_ref: [Ho*Wo, Cout]      f32
    cin = x_ref.shape[-1]
    cout = w_ref.shape[-1]

    x = x_ref[...]  # whole padded image (bf16), resident in VMEM
    acc = jnp.zeros((ho * wo, cout), jnp.float32)

    # Static unroll over the KH*KW taps: each tap is a [Ho*Wo, Cin] @ [Cin, Cout]
    # MXU matmul with f32 accumulation.
    for ky in range(kh):
        for kx in range(kw):
            h0 = ky * dilation
            w0 = kx * dilation
            if stride == 1:
                tap = x[h0:h0 + ho, w0:w0 + wo, :]
            else:
                tap = jax.lax.slice(
                    x,
                    (h0, w0, 0),
                    (h0 + (ho - 1) * stride + 1,
                     w0 + (wo - 1) * stride + 1,
                     cin),
                    (stride, stride, 1),
                )  # [Ho, Wo, Cin]
            acc = acc + jnp.dot(
                tap.reshape(ho * wo, cin),
                w_ref[ky * kw + kx],
                preferred_element_type=jnp.float32,
            )

    # Folded BatchNorm shift + ReLU, all in f32.
    o_ref[...] = jnp.maximum(acc + b_ref[...], 0.0)


def cbr_forward(x_nchw, w_folded, b_folded, *, kernel_size, stride=1, padding=0,
                dilation=1):
    """Forward pass of CBR (Conv2d -> BatchNorm2d(eval) -> ReLU), NCHW in/out."""
    N, Cin, H, W = x_nchw.shape
    kh = kw = kernel_size
    Cout = w_folded.shape[-1]
    Ho = (H + 2 * padding - dilation * (kh - 1) - 1) // stride + 1
    Wo = (W + 2 * padding - dilation * (kw - 1) - 1) // stride + 1

    # NCHW -> NHWC (channels on lane axis), spatial zero-pad, bf16 activations.
    x = jnp.transpose(x_nchw, (0, 2, 3, 1))
    if padding:
        x = jnp.pad(x, ((0, 0), (padding, padding), (padding, padding), (0, 0)))
    x = x.astype(jnp.bfloat16)
    Hp, Wp = x.shape[1], x.shape[2]

    kernel = functools.partial(
        _cbr_kernel, kh=kh, kw=kw, stride=stride, dilation=dilation, ho=Ho, wo=Wo
    )

    out = pl.pallas_call(
        kernel,
        out_shape=jax.ShapeDtypeStruct((N, Ho * Wo, Cout), jnp.float32),
        grid=(N,),
        in_specs=[
            # Per-image activation tile; batch dim squeezed inside the kernel.
            pl.BlockSpec((None, Hp, Wp, Cin), lambda n: (n, 0, 0, 0)),
            # Weights / bias: constant index_map -> stay resident across steps.
            pl.BlockSpec((kh * kw, Cin, Cout), lambda n: (0, 0, 0)),
            pl.BlockSpec((1, Cout), lambda n: (0, 0)),
        ],
        out_specs=pl.BlockSpec((None, Ho * Wo, Cout), lambda n: (n, 0, 0)),
        compiler_params=pltpu.CompilerParams(
            dimension_semantics=("parallel",)),
    )(x, w_folded, b_folded)

    # Back to PyTorch's NCHW output layout.
    return jnp.transpose(out.reshape(N, Ho, Wo, Cout), (0, 3, 1, 2))


# ----------------------------------------------------------------------------
# Parameter construction: Conv2d weight + BatchNorm2d fold (eval mode)
# ----------------------------------------------------------------------------
def make_params(key, cin, cout, kernel_size, eps=1e-5):
    kh = kw = kernel_size
    k = jax.random.split(key, 5)

    # PyTorch Conv2d weight layout is [Cout, Cin, KH, KW] (bias=False).
    fan_in = cin * kh * kw
    w_torch = jax.random.uniform(
        k[0], (cout, cin, kh, kw), jnp.float32, -1.0, 1.0
    ) / jnp.sqrt(float(fan_in))

    # BatchNorm2d affine parameters + running statistics (eval mode).
    gamma = 1.0 + 0.1 * jax.random.normal(k[1], (cout,), jnp.float32)
    beta = 0.1 * jax.random.normal(k[2], (cout,), jnp.float32)
    running_mean = 0.1 * jax.random.normal(k[3], (cout,), jnp.float32)
    running_var = jax.random.uniform(k[4], (cout,), jnp.float32, 0.5, 1.5)

    scale = gamma / jnp.sqrt(running_var + eps)      # [Cout]
    shift = beta - running_mean * scale              # [Cout]

    # One-time host-side reorder: [Cout,Cin,KH,KW] -> [KH*KW, Cin, Cout],
    # with the BN scale folded into the weights (bf16 for the MXU).
    w = jnp.transpose(w_torch, (2, 3, 1, 0)).reshape(kh * kw, cin, cout)
    w_folded = (w * scale[None, None, :]).astype(jnp.bfloat16)
    b_folded = shift.reshape(1, cout).astype(jnp.float32)
    return w_folded, b_folded


# ----------------------------------------------------------------------------
# Pure-JAX reference (same bf16 rounding of inputs) for a correctness check
# ----------------------------------------------------------------------------
def ref_forward(x_nchw, w_folded, b_folded, *, kernel_size, stride, padding,
                dilation):
    kh = kw = kernel_size
    cin, cout = w_folded.shape[1], w_folded.shape[2]
    x = jnp.transpose(x_nchw, (0, 2, 3, 1)).astype(jnp.bfloat16).astype(jnp.float32)
    w_hwio = w_folded.astype(jnp.float32).reshape(kh, kw, cin, cout)
    y = jax.lax.conv_general_dilated(
        x, w_hwio,
        window_strides=(stride, stride),
        padding=[(padding, padding), (padding, padding)],
        rhs_dilation=(dilation, dilation),
        dimension_numbers=("NHWC", "HWIO", "NHWC"),
    )
    y = jnp.maximum(y + b_folded.reshape(1, 1, 1, cout), 0.0)
    return jnp.transpose(y, (0, 3, 1, 2))


if __name__ == "__main__":
    # Small configuration consistent with the CBR block:
    #   batch=2, in_channels=16, out_channels=32, 16x16 spatial,
    #   kernel_size=3, stride=1, padding=1, dilation=1, bias=False.
    N, CIN, COUT, H, W = 2, 16, 32, 16, 16
    KSIZE, STRIDE, PAD, DIL = 3, 1, 1, 1

    key = jax.random.PRNGKey(0)
    kx, kp = jax.random.split(key)
    x = jax.random.normal(kx, (N, CIN, H, W), jnp.float32)   # NCHW like PyTorch
    w_folded, b_folded = make_params(kp, CIN, COUT, KSIZE)

    fwd = jax.jit(functools.partial(
        cbr_forward, kernel_size=KSIZE, stride=STRIDE, padding=PAD, dilation=DIL))
    out = fwd(x, w_folded, b_folded)
    jax.block_until_ready(out)

    HO = (H + 2 * PAD - DIL * (KSIZE - 1) - 1) // STRIDE + 1
    WO = (W + 2 * PAD - DIL * (KSIZE - 1) - 1) // STRIDE + 1
    assert out.shape == (N, COUT, HO, WO), out.shape
    assert out.dtype == jnp.float32
    assert bool(jnp.all(out >= 0.0))  # ReLU output is non-negative

    ref = ref_forward(x, w_folded, b_folded, kernel_size=KSIZE, stride=STRIDE,
                      padding=PAD, dilation=DIL)
    assert bool(jnp.allclose(out, ref, rtol=1e-2, atol=1e-2)), (
        float(jnp.max(jnp.abs(out - ref))))

    print("KERNEL_OK")
</pallas_src>

<mosaic_0001>
module attributes {stable_mosaic.version = 11 : i64} {
  func.func @_cbr_kernel(%arg0: i32, %arg1: memref<1x18x18x16xbf16, #tpu.memory_space<vmem>>, %arg2: memref<9x16x32xbf16, #tpu.memory_space<vmem>>, %arg3: memref<1x32xf32, #tpu.memory_space<vmem>>, %arg4: memref<1x256x32xf32, #tpu.memory_space<vmem>>) attributes {dimension_semantics = [#tpu.dimension_semantics<parallel>], iteration_bounds = array<i64: 2>, scalar_prefetch = 0 : i64, scratch_operands = 0 : i64, tpu.core_type = #tpu.core_type<tc>, window_params = [{transform_indices = @transform_0, window_bounds = array<i64: 1, 18, 18, 16>}, {pipeline_mode = #tpu.pipeline_mode<synchronous>, transform_indices = @transform_1, window_bounds = array<i64: 9, 16, 32>}, {pipeline_mode = #tpu.pipeline_mode<synchronous>, transform_indices = @transform_2, window_bounds = array<i64: 1, 32>}, {transform_indices = @transform_3, window_bounds = array<i64: 1, 256, 32>}]} {
    %c0 = arith.constant 0 : index
    %c0_0 = arith.constant 0 : index
    %c0_1 = arith.constant 0 : index
    %c0_2 = arith.constant 0 : index
    %0 = vector.load %arg1[%c0, %c0_0, %c0_1, %c0_2] : memref<1x18x18x16xbf16, #tpu.memory_space<vmem>>, vector<1x18x18x16xbf16>
    %1 = vector.shape_cast %0 : vector<1x18x18x16xbf16> to vector<18x18x16xbf16>
    %cst = arith.constant 0.000000e+00 : f32
    %2 = vector.broadcast %cst : f32 to vector<256x32xf32>
    %3 = vector.extract_strided_slice %1 {offsets = [0, 0, 0], sizes = [16, 16, 16], strides = [1, 1, 1]} : vector<18x18x16xbf16> to vector<16x16x16xbf16>
    %4 = vector.shape_cast %3 : vector<16x16x16xbf16> to vector<256x16xbf16>
    %c0_3 = arith.constant 0 : index
    %c0_4 = arith.constant 0 : index
    %c0_5 = arith.constant 0 : index
    %5 = vector.load %arg2[%c0_3, %c0_4, %c0_5] : memref<9x16x32xbf16, #tpu.memory_space<vmem>>, vector<1x16x32xbf16>
    %6 = vector.shape_cast %5 : vector<1x16x32xbf16> to vector<16x32xbf16>
    %cst_6 = arith.constant dense<0.000000e+00> : vector<256x32xf32>
    %7 = tpu.matmul %4, %6, %cst_6 {dimension_numbers = #tpu.dot_dimension_numbers<[1], [0], [0], [1], [0, 0, 1, 1], [], []>} : vector<256x16xbf16>, vector<16x32xbf16>, vector<256x32xf32> -> vector<256x32xf32>
    %8 = arith.addf %2, %7 : vector<256x32xf32>
    %9 = vector.extract_strided_slice %1 {offsets = [0, 1, 0], sizes = [16, 16, 16], strides = [1, 1, 1]} : vector<18x18x16xbf16> to vector<16x16x16xbf16>
    %10 = vector.shape_cast %9 : vector<16x16x16xbf16> to vector<256x16xbf16>
    %c1 = arith.constant 1 : index
    %c0_7 = arith.constant 0 : index
    %c0_8 = arith.constant 0 : index
    %11 = vector.load %arg2[%c1, %c0_7, %c0_8] : memref<9x16x32xbf16, #tpu.memory_space<vmem>>, vector<1x16x32xbf16>
    %12 = vector.shape_cast %11 : vector<1x16x32xbf16> to vector<16x32xbf16>
    %cst_9 = arith.constant dense<0.000000e+00> : vector<256x32xf32>
    %13 = tpu.matmul %10, %12, %cst_9 {dimension_numbers = #tpu.dot_dimension_numbers<[1], [0], [0], [1], [0, 0, 1, 1], [], []>} : vector<256x16xbf16>, vector<16x32xbf16>, vector<256x32xf32> -> vector<256x32xf32>
    %14 = arith.addf %8, %13 : vector<256x32xf32>
    %15 = vector.extract_strided_slice %1 {offsets = [0, 2, 0], sizes = [16, 16, 16], strides = [1, 1, 1]} : vector<18x18x16xbf16> to vector<16x16x16xbf16>
    %16 = vector.shape_cast %15 : vector<16x16x16xbf16> to vector<256x16xbf16>
    %c2 = arith.constant 2 : index
    %c0_10 = arith.constant 0 : index
    %c0_11 = arith.constant 0 : index
    %17 = vector.load %arg2[%c2, %c0_10, %c0_11] : memref<9x16x32xbf16, #tpu.memory_space<vmem>>, vector<1x16x32xbf16>
    %18 = vector.shape_cast %17 : vector<1x16x32xbf16> to vector<16x32xbf16>
    %cst_12 = arith.constant dense<0.000000e+00> : vector<256x32xf32>
    %19 = tpu.matmul %16, %18, %cst_12 {dimension_numbers = #tpu.dot_dimension_numbers<[1], [0], [0], [1], [0, 0, 1, 1], [], []>} : vector<256x16xbf16>, vector<16x32xbf16>, vector<256x32xf32> -> vector<256x32xf32>
    %20 = arith.addf %14, %19 : vector<256x32xf32>
    %21 = vector.extract_strided_slice %1 {offsets = [1, 0, 0], sizes = [16, 16, 16], strides = [1, 1, 1]} : vector<18x18x16xbf16> to vector<16x16x16xbf16>
    %22 = vector.shape_cast %21 : vector<16x16x16xbf16> to vector<256x16xbf16>
    %c3 = arith.constant 3 : index
    %c0_13 = arith.constant 0 : index
    %c0_14 = arith.constant 0 : index
    %23 = vector.load %arg2[%c3, %c0_13, %c0_14] : memref<9x16x32xbf16, #tpu.memory_space<vmem>>, vector<1x16x32xbf16>
    %24 = vector.shape_cast %23 : vector<1x16x32xbf16> to vector<16x32xbf16>
    %cst_15 = arith.constant dense<0.000000e+00> : vector<256x32xf32>
    %25 = tpu.matmul %22, %24, %cst_15 {dimension_numbers = #tpu.dot_dimension_numbers<[1], [0], [0], [1], [0, 0, 1, 1], [], []>} : vector<256x16xbf16>, vector<16x32xbf16>, vector<256x32xf32> -> vector<256x32xf32>
    %26 = arith.addf %20, %25 : vector<256x32xf32>
    %27 = vector.extract_strided_slice %1 {offsets = [1, 1, 0], sizes = [16, 16, 16], strides = [1, 1, 1]} : vector<18x18x16xbf16> to vector<16x16x16xbf16>
    %28 = vector.shape_cast %27 : vector<16x16x16xbf16> to vector<256x16xbf16>
    %c4 = arith.constant 4 : index
    %c0_16 = arith.constant 0 : index
    %c0_17 = arith.constant 0 : index
    %29 = vector.load %arg2[%c4, %c0_16, %c0_17] : memref<9x16x32xbf16, #tpu.memory_space<vmem>>, vector<1x16x32xbf16>
    %30 = vector.shape_cast %29 : vector<1x16x32xbf16> to vector<16x32xbf16>
    %cst_18 = arith.constant dense<0.000000e+00> : vector<256x32xf32>
    %31 = tpu.matmul %28, %30, %cst_18 {dimension_numbers = #tpu.dot_dimension_numbers<[1], [0], [0], [1], [0, 0, 1, 1], [], []>} : vector<256x16xbf16>, vector<16x32xbf16>, vector<256x32xf32> -> vector<256x32xf32>
    %32 = arith.addf %26, %31 : vector<256x32xf32>
    %33 = vector.extract_strided_slice %1 {offsets = [1, 2, 0], sizes = [16, 16, 16], strides = [1, 1, 1]} : vector<18x18x16xbf16> to vector<16x16x16xbf16>
    %34 = vector.shape_cast %33 : vector<16x16x16xbf16> to vector<256x16xbf16>
    %c5 = arith.constant 5 : index
    %c0_19 = arith.constant 0 : index
    %c0_20 = arith.constant 0 : index
    %35 = vector.load %arg2[%c5, %c0_19, %c0_20] : memref<9x16x32xbf16, #tpu.memory_space<vmem>>, vector<1x16x32xbf16>
    %36 = vector.shape_cast %35 : vector<1x16x32xbf16> to vector<16x32xbf16>
    %cst_21 = arith.constant dense<0.000000e+00> : vector<256x32xf32>
    %37 = tpu.matmul %34, %36, %cst_21 {dimension_numbers = #tpu.dot_dimension_numbers<[1], [0], [0], [1], [0, 0, 1, 1], [], []>} : vector<256x16xbf16>, vector<16x32xbf16>, vector<256x32xf32> -> vector<256x32xf32>
    %38 = arith.addf %32, %37 : vector<256x32xf32>
    %39 = vector.extract_strided_slice %1 {offsets = [2, 0, 0], sizes = [16, 16, 16], strides = [1, 1, 1]} : vector<18x18x16xbf16> to vector<16x16x16xbf16>
    %40 = vector.shape_cast %39 : vector<16x16x16xbf16> to vector<256x16xbf16>
    %c6 = arith.constant 6 : index
    %c0_22 = arith.constant 0 : index
    %c0_23 = arith.constant 0 : index
    %41 = vector.load %arg2[%c6, %c0_22, %c0_23] : memref<9x16x32xbf16, #tpu.memory_space<vmem>>, vector<1x16x32xbf16>
    %42 = vector.shape_cast %41 : vector<1x16x32xbf16> to vector<16x32xbf16>
    %cst_24 = arith.constant dense<0.000000e+00> : vector<256x32xf32>
    %43 = tpu.matmul %40, %42, %cst_24 {dimension_numbers = #tpu.dot_dimension_numbers<[1], [0], [0], [1], [0, 0, 1, 1], [], []>} : vector<256x16xbf16>, vector<16x32xbf16>, vector<256x32xf32> -> vector<256x32xf32>
    %44 = arith.addf %38, %43 : vector<256x32xf32>
    %45 = vector.extract_strided_slice %1 {offsets = [2, 1, 0], sizes = [16, 16, 16], strides = [1, 1, 1]} : vector<18x18x16xbf16> to vector<16x16x16xbf16>
    %46 = vector.shape_cast %45 : vector<16x16x16xbf16> to vector<256x16xbf16>
    %c7 = arith.constant 7 : index
    %c0_25 = arith.constant 0 : index
    %c0_26 = arith.constant 0 : index
    %47 = vector.load %arg2[%c7, %c0_25, %c0_26] : memref<9x16x32xbf16, #tpu.memory_space<vmem>>, vector<1x16x32xbf16>
    %48 = vector.shape_cast %47 : vector<1x16x32xbf16> to vector<16x32xbf16>
    %cst_27 = arith.constant dense<0.000000e+00> : vector<256x32xf32>
    %49 = tpu.matmul %46, %48, %cst_27 {dimension_numbers = #tpu.dot_dimension_numbers<[1], [0], [0], [1], [0, 0, 1, 1], [], []>} : vector<256x16xbf16>, vector<16x32xbf16>, vector<256x32xf32> -> vector<256x32xf32>
    %50 = arith.addf %44, %49 : vector<256x32xf32>
    %51 = vector.extract_strided_slice %1 {offsets = [2, 2, 0], sizes = [16, 16, 16], strides = [1, 1, 1]} : vector<18x18x16xbf16> to vector<16x16x16xbf16>
    %52 = vector.shape_cast %51 : vector<16x16x16xbf16> to vector<256x16xbf16>
    %c8 = arith.constant 8 : index
    %c0_28 = arith.constant 0 : index
    %c0_29 = arith.constant 0 : index
    %53 = vector.load %arg2[%c8, %c0_28, %c0_29] : memref<9x16x32xbf16, #tpu.memory_space<vmem>>, vector<1x16x32xbf16>
    %54 = vector.shape_cast %53 : vector<1x16x32xbf16> to vector<16x32xbf16>
    %cst_30 = arith.constant dense<0.000000e+00> : vector<256x32xf32>
    %55 = tpu.matmul %52, %54, %cst_30 {dimension_numbers = #tpu.dot_dimension_numbers<[1], [0], [0], [1], [0, 0, 1, 1], [], []>} : vector<256x16xbf16>, vector<16x32xbf16>, vector<256x32xf32> -> vector<256x32xf32>
    %56 = arith.addf %50, %55 : vector<256x32xf32>
    %c0_31 = arith.constant 0 : index
    %c0_32 = arith.constant 0 : index
    %57 = vector.load %arg3[%c0_31, %c0_32] : memref<1x32xf32, #tpu.memory_space<vmem>>, vector<1x32xf32>
    %58 = vector.broadcast %57 : vector<1x32xf32> to vector<256x32xf32>
    %59 = arith.addf %56, %58 : vector<256x32xf32>
    %cst_33 = arith.constant 0.000000e+00 : f32
    %60 = vector.broadcast %cst_33 : f32 to vector<256x32xf32>
    %61 = arith.maximumf %59, %60 : vector<256x32xf32>
    %c0_34 = arith.constant 0 : index
    %c0_35 = arith.constant 0 : index
    %c0_36 = arith.constant 0 : index
    %62 = vector.load %arg4[%c0_34, %c0_35, %c0_36] : memref<1x256x32xf32, #tpu.memory_space<vmem>>, vector<1x256x32xf32>
    %63 = vector.shape_cast %62 : vector<1x256x32xf32> to vector<256x32xf32>
    %64 = vector.shape_cast %61 : vector<256x32xf32> to vector<1x256x32xf32>
    tpu.vector_store %arg4[%c0_34, %c0_35, %c0_36], %64 {strides = array<i32>} : memref<1x256x32xf32, #tpu.memory_space<vmem>>, vector<1x256x32xf32>,
    return
  }
  func.func @transform_0(%arg0: i32) -> (i32, i32, i32, i32) {
    %c0_i32 = arith.constant 0 : i32
    %c0_i32_0 = arith.constant 0 : i32
    %c0_i32_1 = arith.constant 0 : i32
    %c0_i32_2 = arith.constant 0 : i32
    return %arg0, %c0_i32, %c0_i32_0, %c0_i32_1 : i32, i32, i32, i32
  }
  func.func @transform_1(%arg0: i32) -> (i32, i32, i32) {
    %c0_i32 = arith.constant 0 : i32
    %c0_i32_0 = arith.constant 0 : i32
    %c0_i32_1 = arith.constant 0 : i32
    %c0_i32_2 = arith.constant 0 : i32
    return %c0_i32, %c0_i32_0, %c0_i32_1 : i32, i32, i32
  }
  func.func @transform_2(%arg0: i32) -> (i32, i32) {
    %c0_i32 = arith.constant 0 : i32
    %c0_i32_0 = arith.constant 0 : i32
    %c0_i32_1 = arith.constant 0 : i32
    return %c0_i32, %c0_i32_0 : i32, i32
  }
  func.func @transform_3(%arg0: i32) -> (i32, i32, i32) {
    %c0_i32 = arith.constant 0 : i32
    %c0_i32_0 = arith.constant 0 : i32
    %c0_i32_1 = arith.constant 0 : i32
    return %arg0, %c0_i32, %c0_i32_0 : i32, i32, i32
  }
}

</mosaic_0001>

<bundles_post_ra>
// kernel: cbr_forward.1
= control target key start
LH: loop header
LB: loop body
LE: loop exit
PB: predicated region body
PF: predicated region fallthrough
CT: control target
= control target key end

     0   :  { %8 = vsyncpa [#allocation3], 0  ;;  %s5578_s0 = inlined_call_operand.vmem [shape: bf16[2,18,18,16], index: 0, kind: input, shape index: {}]   ;;  %s5579_s1 = inlined_call_operand.vmem [shape: bf16[9,16,32], index: 1, kind: input, shape index: {}]   ;;  %s5580_s2 = inlined_call_operand.vmem [shape: f32[1,32], index: 2, kind: input, shape index: {}]   ;;  %s5581_s3 = inlined_call_operand.hbm [shape: f32[2,256,32], index: 3, kind: output, shape index: {}]  }
   0x1   :  { %10 = vsyncpa [#allocation3 + $0x1], 0  ;;  %s3969_s12 = smov 0   ;;  %s3971_s13 = smov 0  }
   0x2   :  { %s3973_s14 = smov 0   ;;  %s3975_s15 = smov 0  }
   0x3 LB: > { %s3990_s16 = sadd.s32 4294967295, %s3944_s15   ;;  %s3100_s17 = sadd.s32 4294967294, %s3944_s15   ;;  %s3944_s15 = sphi %s3975_s15, %s5789_s15   ;;  %s3940_s14 = sphi %s3973_s14, %s5788_s14   ;;  %s3936_s13 = sphi %s3971_s13, %s5787_s13   ;;  %s3932_s12 = sphi %s3969_s12, %s5786_s12  }
   0x4   : > { %s3994_s18 = sadd.s32 1, %s3944_s15   ;;  %s91_s19 = sadd.s32 1, %s3940_s14 }
   0x5   : > { %s88_s20 = ssub.s32 %s3944_s15, %s3994_s18  ;;  %p101_p0 = scmp.ne.s32.totalorder %s3940_s14, %s3936_s13 }
   0x6   : > { %p89_p1 = scmp.eq.s32.totalorder %s88_s20, 0  ;;  %p102_p2 = scmp.eq.s32.totalorder %s3990_s16, 1 }
   0x7   : > { %p107_p3 = scmp.ne.s32.totalorder %s3936_s13, %s3932_s12  ;;  %p108_p4 = scmp.eq.s32.totalorder %s3100_s17, 1 }
   0x8   : > { %s4005_s21 = scalar_select %p89_p1, %s3940_s14, %s91_s19  }
   0x9   : > { %p4007_p5 = por %p102_p2, %p101_p0  ;;  %p4011_p6 = por %p108_p4, %p107_p3 }
   0xa   : > { %p3103_p7 = scmp.ge.s32.totalorder %s3944_s15, 1  ;;  %p140_p8 = scmp.lt.s32.totalorder %s3944_s15, 3 }
   0xc   : > { %p141_p9 = pnand %p3103_p7, %p140_p8 }
   0xe   : > { %144 = sbr.rel (%p141_p9) target bundleno = 578 (0x242), region = 32 }
  0x13   : > { %v3857_v0 = vld [vmem:[%s5579_s1 + $0x8] sm:$0xff]   ;;  %p164_p10 = scmp.lt.s32.totalorder %s3990_s16, 1  ;;  %v4024_v1 = vld [vmem:[%s5579_s1] sm:$0xff]   ;;  %v4030_v2 = vld [vmem:[%s5579_s1 + $0x10] sm:$0xff]   ;;  %vm226_vm0 = vsmask.f32 3328 }
  0x14   : > { %3813 = vmatprep.subr.bf16.mxu1 %v3857_v0  ;;  %3507 = vmatprep.subr.bf16.mxu0 %v3857_v0  ;;  %vm227_vm1 = vsmask.f32 7440  ;;  %vm670_vm2 = vcmask 130048   ;;  %v5627_v29 = vmov 0  ;;  %vm1191_vm4 = vcmask 1042432   ;;  %s161_s29 = sand.u32 1, %s3936_s13  }
  0x15   : > { %s165_s28 = scalar_select %p164_p10, %s3990_s16, 1  ;;  %3814 = vmatpush3.bf16.msra.mxu1 %v3857_v0  ;;  %3508 = vmatpush3.bf16.msra.mxu0 %v3857_v0  ;;  %vm4076_vm3 = vmor %vm226_vm0, %vm227_vm1  ;;  %vm1192_vm5 = vcmask 1046532   ;;  %vm2991_vm7 = vcmask 261120  }
  0x16   : > { %3541 = vmatprep.subr.bf16.mxu1 %v4024_v1  ;;  %3575 = vmatprep.subr.bf16.mxu0 %v4030_v2  ;;  %v5628_v29 = vsel %vm4076_vm3, 4294967295, %v5627_v29  ;;  %vm4397_vm6 = vmor %vm1191_vm4, %vm1192_vm5  ;;  %s3104_s5 = sshll.u32 %s161_s29, 8  ;;  %s3946_s19 = smov [#allocation2]  }
  0x17   : > { %s3815_s4 = smul.u32 216, %s165_s28  ;;  %5629 = vst [vmem:[#allocation5_spill] sm:$0xff] %v5628_v29  ;;  %s5357_s6 = scalar_lea.vmem [#allocation2], %s3104_s5 }
  0x18   : > { %s3038_s8 = sshll.u32 %s5357_s6, 4  ;;  %s3888_s20 = sshll.u32 %s3946_s19, 4  ;;  %s5530_s8 = int_to_ptr.vmem [resolvable:$true] %s3038_s8  ;;  %s3889_s20 = int_to_ptr.vmem [resolvable:$false] %s3888_s20 }
  0x19   : > { %s4037_s7 = scalar_lea.vmem %s5578_s0, %s3815_s4  ;;  %s3884_s17 = scalar_lea.vmem %s5530_s8, 4096 }
  0x1a   : > { %v4040_v3 = vld [vmem:[%s4037_s7] sm:$0xf]  ;;  %v4043_v4 = vld [vmem:[%s4037_s7 + $0x4] sm:$0xf]  ;;  %v4046_v5 = vld [vmem:[%s4037_s7 + $0x8] sm:$0x1]  ;;  %p3885_p11 = scmp.ne.s32.totalorder %s5530_s8, %s3884_s17  ;;  %p3891_p0 = scmp.lt.s32.totalorder %s5530_s8, %s3889_s20 }
  0x1b   : > { %v230_v6 = vshrl.u32 %v4040_v3, 16  ;;  %v233_v7 = vshll.u32 %v4040_v3, 16  ;;  %v239_v8 = vshll.u32 %v4043_v4, 16  ;;  %v243_v9 = vshrl.u32 %v4043_v4, 16  ;;  %v4053_v10 = vld [vmem:[%s4037_s7 + $0x60] sm:$0xf] }
  0x1c   : > { %v249_v11 = vshll.u32 %v4046_v5, 16  ;;  %v4058_v13 = vld [vmem:[%s4037_s7 + $0x64] sm:$0xf]  ;;  %v4061_v14 = vld [vmem:[%s4037_s7 + $0x68] sm:$0x1]  ;;  %v422_v20 = vshrl.u32 %v4053_v10, 16  ;;  %p3886_p12 = pnand %p3885_p11, %p4007_p5 }
  0x1d   : > { %v232_v15 = vrot.slane %v230_v6, 4  ;;  %v235_v16 = vrot.slane %v233_v7, 5  ;;  %v241_v17 = vrot.slane %v239_v8, 5  ;;  %v245_v18 = vrot.slane %v243_v9, 4  ;;  %v4069_v27 = vld [vmem:[%s4037_s7 + $0xc] sm:$0xf] }
  0x1e   : > { %v251_v19 = vrot.slane %v249_v11, 5  ;;  %v425_v21 = vshll.u32 %v4053_v10, 16  ;;  %v431_v22 = vshll.u32 %v4058_v13, 16  ;;  %v435_v25 = vshrl.u32 %v4058_v13, 16  ;;  %v4072_v28 = vld [vmem:[%s4037_s7 + $0x10] sm:$0xf]  ;;  %p3887_p13 = pneg %p3886_p12 }
  0x1f   : > { %v236_v23 = vor.u32 %v235_v16, %v232_v15  ;;  %v246_v24 = vor.u32 %v245_v18, %v241_v17  ;;  %v441_v26 = vshll.u32 %v4061_v14, 16  ;;  %v424_v30 = vrot.slane %v422_v20, 4  ;;  %v4083_v39 = vld [vmem:[%s4037_s7 + $0x14] sm:$0x1]  ;;  %v4094_v51 = vld [vmem:[%s4037_s7 + $0x6c] sm:$0xf] }
  0x20   : > { %v427_v31 = vrot.slane %v425_v21, 5  ;;  %v433_v32 = vrot.slane %v431_v22, 5  ;;  %v437_v36 = vrot.slane %v435_v25, 4  ;;  %v254_v40 = vshrl.u32 %v4069_v27, 16  ;;  %5630 = vst [vmem:[#allocation6_spill] sm:$0xff] %v4094_v51  ;;  %s3890_s24 = scalar_lea.vmem %s3889_s20, 8192 }
  0x21   : > { %v237_v34 = vrot.slane %v236_v23, 4  ;;  %v247_v35 = vrot.slane %v246_v24, 4  ;;  %v443_v37 = vrot.slane %v441_v26, 5  ;;  %v257_v41 = vshll.u32 %v4069_v27, 16  ;;  %v4098_v56 = vld [vmem:[%s4037_s7 + $0x70] sm:$0xf]  ;;  %p3892_p1 = scmp.lt.s32.totalorder %s3890_s24, %s3884_s17 }
  0x22   : > { %v428_v38 = vor.u32 %v427_v31, %v424_v30  ;;  %v263_v42 = vshll.u32 %v4072_v28, 16  ;;  %v438_v45 = vor.u32 %v437_v36, %v433_v32  ;;  %v267_v46 = vshrl.u32 %v4072_v28, 16  ;;  %v4106_v61 = vld [vmem:[%s4037_s7 + $0x74] sm:$0x1]  ;;  %v4112_v7 = vld [vmem:[%s4037_s7 + $0x18] sm:$0xf] }
  0x23   : > { %v242_v43 = vsel %vm4076_vm3, %v237_v34, %v241_v17  ;;  %v252_v44 = vsel %vm4076_vm3, %v247_v35, %v251_v19  ;;  %v256_v49 = vrot.slane %v254_v40, 4  ;;  %v259_v50 = vrot.slane %v257_v41, 5  ;;  %5631 = vst [vmem:[#allocation7_spill] sm:$0xff] %v4106_v61  ;;  %v4121_v20 = vld [vmem:[%s4037_s7 + $0x1c] sm:$0xf]  ;;  %v4143_v40 = vld [vmem:[%s5579_s1 + $0x20] sm:$0xff]   ;;  %p3893_p2 = por %p3892_p1, %p3891_p0 }
  0x24   : > { %v3108_v47 = vcombine.low %v242_v43, %v252_v44  ;;  %v429_v48 = vrot.slane %v428_v38, 4  ;;  %v439_v52 = vrot.slane %v438_v45, 4  ;;  %v265_v53 = vrot.slane %v263_v42, 5  ;;  %v4128_v24 = vld [vmem:[%s4037_s7 + $0x20] sm:$0x1] }
  0x25   : > { %v269_v54 = vrot.slane %v267_v46, 4  ;;  %v273_v55 = vshll.u32 %v4083_v39, 16  ;;  %v260_v58 = vor.u32 %v259_v50, %v256_v49  ;;  %v446_v6 = vshrl.u32 %v4094_v51, 16  ;;  %v4135_v34 = vld [vmem:[%s4037_s7 + $0x78] sm:$0xf]  ;;  %p3894_p3 = pnand %p3893_p2, %p3887_p13 }
  0x26   : > { %3509 = vmatprep.mubr.msk.bf16.mxu0 %vm670_vm2, %v3108_v47  ;;  %v434_v57 = vsel %vm4076_vm3, %v429_v48, %v433_v32  ;;  %v444_v62 = vsel %vm4076_vm3, %v439_v52, %v443_v37  ;;  %v449_v11 = vshll.u32 %v4094_v51, 16  ;;  %v455_v15 = vshll.u32 %v4098_v56, 16  ;;  %5633 = vst [vmem:[#allocation9_spill] sm:$0xff] %v4135_v34  ;;  %v4148_v45 = vld [vmem:[%s4037_s7 + $0x7c] sm:$0xf] }
  0x27   : > { %v270_v63 = vor.u32 %v269_v54, %v265_v53  ;;  %v275_v0 = vrot.slane %v273_v55, 5  ;;  %v4114_v8 = vcombine.low %v434_v57, %v444_v62  ;;  %v261_v9 = vrot.slane %v260_v58, 4  ;;  %5635 = vst [vmem:[#allocation11_spill] sm:$0xff] %v4148_v45  ;;  %v4156_v55 = vld [vmem:[%s4037_s7 + $0x80] sm:$0x1] }
  0x28   : > { %v448_v17 = vrot.slane %v446_v6, 4  ;;  %v459_v18 = vshrl.u32 %v4098_v56, 16  ;;  %v465_v19 = vshll.u32 %v4106_v61, 16  ;;  %v451_v22 = vrot.slane %v449_v11, 5  ;;  %5636 = vst [vmem:[#allocation12_spill] sm:$0xff] %v4156_v55 }
  0x29   : > { %5632 = vst [vmem:[#allocation8_spill] sm:$0xff] %v4114_v8  ;;  %v271_v16 = vrot.slane %v270_v63, 4  ;;  %3525 = vmatprep.mubr.msk.bf16.mxu1 %vm670_vm2, %v4114_v8  ;;  %v266_v21 = vsel %vm4076_vm3, %v261_v9, %v265_v53  ;;  %v457_v23 = vrot.slane %v455_v15, 5  ;;  %v278_v25 = vshrl.u32 %v4112_v7, 16  ;;  %v4169_v15 = vld [vmem:[%s4037_s7 + $0x28] sm:$0xf] }
  0x2a   : > { %v461_v30 = vrot.slane %v459_v18, 4  ;;  %v467_v31 = vrot.slane %v465_v19, 5  ;;  %v281_v32 = vshll.u32 %v4112_v7, 16  ;;  %v452_v36 = vor.u32 %v451_v22, %v448_v17 }
  0x2b   : > { %v276_v26 = vsel %vm4076_vm3, %v271_v16, %v275_v0  ;;  %v280_v37 = vrot.slane %v278_v25, 4  ;;  %v287_v38 = vshll.u32 %v4121_v20, 16  ;;  %v291_v43 = vshrl.u32 %v4121_v20, 16  ;;  %v4162_v0 = vld [vmem:[%s4037_s7 + $0x24] sm:$0xf] }
  0x2c   : > { %v4137_v35 = vcombine.low %v266_v21, %v276_v26  ;;  %v462_v41 = vor.u32 %v461_v30, %v457_v23  ;;  %v283_v42 = vrot.slane %v281_v32, 5  ;;  %v297_v44 = vshll.u32 %v4128_v24, 16  ;;  %v4177_v21 = vld [vmem:[%s5579_s1 + $0x18] sm:$0xff]   ;;  %v4182_v26 = vld [vmem:[%s4037_s7 + $0x2c] sm:$0x1] }
  0x2d   : > { %v453_v46 = vrot.slane %v452_v36, 4  ;;  %v289_v47 = vrot.slane %v287_v38, 5  ;;  %v470_v48 = vshrl.u32 %v4135_v34, 16  ;;  %v473_v49 = vshll.u32 %v4135_v34, 16  ;;  %v4190_v38 = vld [vmem:[%s4037_s7 + $0x84] sm:$0xf] }
  0x2e   : > { %5634 = vst [vmem:[#allocation10_spill] sm:$0xff] %v4137_v35  ;;  %3510 = vmatmul.mubr.msk.bf16.vlgmr.msra.gmra.mxu0 %vm670_vm2, %v4137_v35  ;;  %v463_v50 = vrot.slane %v462_v41, 4  ;;  %v284_v52 = vor.u32 %v283_v42, %v280_v37  ;;  %v293_v53 = vrot.slane %v291_v43, 4  ;;  %v299_v54 = vrot.slane %v297_v44, 5  ;;  %v4336_v35 = vld [vmem:[%s4037_s7 + $0xb0] sm:$0x1] }
  0x2f   : > { %3576 = vmatpush3.bf16.msra.mxu0 %v4030_v2  ;;  %v458_v57 = vsel %vm4076_vm3, %v453_v46, %v457_v23  ;;  %v472_v58 = vrot.slane %v470_v48, 4  ;;  %v475_v62 = vrot.slane %v473_v49, 5  ;;  %v479_v63 = vshll.u32 %v4148_v45, 16  ;;  %v4197_v46 = vld [vmem:[%s4037_s7 + $0x88] sm:$0xf]  ;;  %5648 = vst [vmem:[#allocation24_spill] sm:$0xff] %v4336_v35 }
  0x30   : > { %3643 = vmatprep.subr.bf16.mxu0 %v4143_v40  ;;  %v468_v2 = vsel %vm4076_vm3, %v463_v50, %v467_v31  ;;  %v285_v6 = vrot.slane %v284_v52, 4  ;;  %v294_v9 = vor.u32 %v293_v53, %v289_v47  ;;  %v483_v11 = vshrl.u32 %v4148_v45, 16  ;;  %v4358_v45 = vld [vmem:[%s4037_s7 + $0x5c] sm:$0x1] }
  0x31   : > { %v4171_v16 = vcombine.low %v458_v57, %v468_v2  ;;  %v476_v17 = vor.u32 %v475_v62, %v472_v58  ;;  %v481_v18 = vrot.slane %v479_v63, 5  ;;  %v489_v19 = vshll.u32 %v4156_v55, 16 }
  0x32   : > { %v290_v22 = vsel %vm4076_vm3, %v285_v6, %v289_v47  ;;  %v295_v23 = vrot.slane %v294_v9, 4  ;;  %v485_v25 = vrot.slane %v483_v11, 4  ;;  %v302_v30 = vshrl.u32 %v4162_v0, 16  ;;  %v4215_v6 = vld [vmem:[%s4037_s7 + $0x30] sm:$0xf] }
  0x33   : > { %5637 = vst [vmem:[#allocation13_spill] sm:$0xff] %v4171_v16  ;;  %3526 = vmatmul.mubr.msk.bf16.vlgmr.msra.gmra.mxu1 %vm670_vm2, %v4171_v16  ;;  %v477_v31 = vrot.slane %v476_v17, 4  ;;  %v491_v32 = vrot.slane %v489_v19, 5  ;;  %v305_v36 = vshll.u32 %v4162_v0, 16  ;;  %v311_v37 = vshll.u32 %v4169_v15, 16 }
  0x34   : > { %3542 = vmatpush3.bf16.msra.mxu1 %v4024_v1  ;;  %v300_v41 = vsel %vm4076_vm3, %v295_v23, %v299_v54  ;;  %v486_v42 = vor.u32 %v485_v25, %v481_v18  ;;  %v304_v43 = vrot.slane %v302_v30, 4  ;;  %v315_v44 = vshrl.u32 %v4169_v15, 16  ;;  %v4206_v54 = vld [vmem:[%s4037_s7 + $0x8c] sm:$0x1]  ;;  %v4220_v19 = vld [vmem:[%s4037_s7 + $0x34] sm:$0xf] }
  0x35   : > { %v4199_v47 = vcombine.low %v290_v22, %v300_v41  ;;  %v482_v48 = vsel %vm4076_vm3, %v477_v31, %v481_v18  ;;  %v307_v49 = vrot.slane %v305_v36, 5  ;;  %v313_v50 = vrot.slane %v311_v37, 5  ;;  %3609 = vmatprep.subr.bf16.mxu1 %v4177_v21  ;;  %v4225_v31 = vld [vmem:[%s4037_s7 + $0x38] sm:$0x1] }
  0x36   : > { %v487_v1 = vrot.slane %v486_v42, 4  ;;  %v317_v52 = vrot.slane %v315_v44, 4  ;;  %v321_v53 = vshll.u32 %v4182_v26, 16  ;;  %v494_v57 = vshrl.u32 %v4190_v38, 16 }
  0x37   : > { %5638 = vst [vmem:[#allocation14_spill] sm:$0xff] %v4199_v47  ;;  %3513 = vmatprep.mubr.msk.bf16.mxu0 %vm670_vm2, %v4199_v47  ;;  %v308_v58 = vor.u32 %v307_v49, %v304_v43  ;;  %v497_v62 = vshll.u32 %v4190_v38, 16  ;;  %v503_v63 = vshll.u32 %v4197_v46, 16  ;;  %v507_v2 = vshrl.u32 %v4197_v46, 16 }
  0x38   : > { %v492_v9 = vsel %vm4076_vm3, %v487_v1, %v491_v32  ;;  %v318_v11 = vor.u32 %v317_v52, %v313_v50  ;;  %v323_v17 = vrot.slane %v321_v53, 5  ;;  %v496_v18 = vrot.slane %v494_v57, 4  ;;  %v4230_v32 = vld [vmem:[%s4037_s7 + $0x90] sm:$0xf]  ;;  %v4239_v1 = vld [vmem:[%s4037_s7 + $0x94] sm:$0xf] }
  0x39   : > { %v4222_v22 = vcombine.low %v482_v48, %v492_v9  ;;  %v309_v23 = vrot.slane %v308_v58, 4  ;;  %v499_v25 = vrot.slane %v497_v62, 5  ;;  %v505_v30 = vrot.slane %v503_v63, 5 }
  0x3a   : > { %v319_v36 = vrot.slane %v318_v11, 4  ;;  %v509_v37 = vrot.slane %v507_v2, 4  ;;  %v513_v41 = vshll.u32 %v4206_v54, 16  ;;  %v326_v42 = vshrl.u32 %v4215_v6, 16 }
  0x3b   : > { %5639 = vst [vmem:[#allocation15_spill] sm:$0xff] %v4222_v22  ;;  %3529 = vmatprep.mubr.msk.bf16.mxu1 %vm670_vm2, %v4222_v22  ;;  %v314_v43 = vsel %vm4076_vm3, %v309_v23, %v313_v50  ;;  %v500_v44 = vor.u32 %v499_v25, %v496_v18  ;;  %v329_v48 = vshll.u32 %v4215_v6, 16  ;;  %v335_v49 = vshll.u32 %v4220_v19, 16  ;;  %v4246_v50 = vld [vmem:[%s4037_s7 + $0x98] sm:$0x1] }
  0x3c   : > { %v324_v52 = vsel %vm4076_vm3, %v319_v36, %v323_v17  ;;  %v510_v53 = vor.u32 %v509_v37, %v505_v30  ;;  %v515_v57 = vrot.slane %v513_v41, 5  ;;  %v328_v58 = vrot.slane %v326_v42, 4  ;;  %v4258_v42 = vld [vmem:[%s4037_s7 + $0x3c] sm:$0xf]  ;;  %v4287_v22 = vld [vmem:[%s4037_s7 + $0xa0] sm:$0xf] }
  0x3d   : > { %v4243_v62 = vcombine.low %v314_v43, %v324_v52  ;;  %v501_v63 = vrot.slane %v500_v44, 4  ;;  %v331_v2 = vrot.slane %v329_v48, 5  ;;  %v337_v9 = vrot.slane %v335_v49, 5  ;;  %v4263_v52 = vld [vmem:[%s4037_s7 + $0x40] sm:$0xf] }
  0x3e   : > { %v511_v11 = vrot.slane %v510_v53, 4  ;;  %v339_v18 = vshrl.u32 %v4220_v19, 16  ;;  %v345_v23 = vshll.u32 %v4225_v31, 16  ;;  %v518_v25 = vshrl.u32 %v4230_v32, 16 }
  0x3f   : > { %5640 = vst [vmem:[#allocation16_spill] sm:$0xff] %v4243_v62  ;;  %3514 = vmatmul.mubr.msk.bf16.gmra.mxu0 %vm670_vm2, %v4243_v62  ;;  %v506_v17 = vsel %vm4076_vm3, %v501_v63, %v505_v30  ;;  %v332_v36 = vor.u32 %v331_v2, %v328_v58  ;;  %v521_v37 = vshll.u32 %v4230_v32, 16  ;;  %v527_v41 = vshll.u32 %v4239_v1, 16 }
  0x40   : > { %v516_v43 = vsel %vm4076_vm3, %v511_v11, %v515_v57  ;;  %v341_v44 = vrot.slane %v339_v18, 4  ;;  %v347_v48 = vrot.slane %v345_v23, 5  ;;  %v520_v49 = vrot.slane %v518_v25, 4  ;;  %v4275_v18 = vld [vmem:[%s4037_s7 + $0x44] sm:$0x1] }
  0x41   : > { %v4265_v53 = vcombine.low %v506_v17, %v516_v43  ;;  %v333_v30 = vrot.slane %v332_v36, 4  ;;  %v523_v58 = vrot.slane %v521_v37, 5  ;;  %v529_v63 = vrot.slane %v527_v41, 5  ;;  %v4280_v17 = vld [vmem:[%s4037_s7 + $0x9c] sm:$0xf] }
  0x42   : > { %v342_v2 = vor.u32 %v341_v44, %v337_v9  ;;  %v531_v33 = vshrl.u32 %v4239_v1, 16  ;;  %v537_v60 = vshll.u32 %v4246_v50, 16  ;;  %v350_v12 = vshrl.u32 %v4258_v42, 16 }
  0x43   : > { %5641 = vst [vmem:[#allocation17_spill] sm:$0xff] %v4265_v53  ;;  %3530 = vmatmul.mubr.msk.bf16.gmra.mxu1 %vm670_vm2, %v4265_v53  ;;  %v338_v57 = vsel %vm4076_vm3, %v333_v30, %v337_v9  ;;  %v524_v11 = vor.u32 %v523_v58, %v520_v49  ;;  %v353_v23 = vshll.u32 %v4258_v42, 16  ;;  %v359_v25 = vshll.u32 %v4263_v52, 16 }
  0x44   : > { %v343_v36 = vrot.slane %v342_v2, 4  ;;  %v533_v37 = vrot.slane %v531_v33, 4  ;;  %v539_v41 = vrot.slane %v537_v60, 5  ;;  %v352_v43 = vrot.slane %v350_v12, 4 }
  0x45   : > { %v525_v44 = vrot.slane %v524_v11, 4  ;;  %v355_v59 = vrot.slane %v353_v23, 5  ;;  %v361_v53 = vrot.slane %v359_v25, 5  ;;  %v363_v9 = vshrl.u32 %v4263_v52, 16  ;;  %v4295_v23 = vld [vmem:[%s4037_s7 + $0xa4] sm:$0x1] }
  0x46   : > { %v348_v49 = vsel %vm4076_vm3, %v343_v36, %v347_v48  ;;  %v534_v30 = vor.u32 %v533_v37, %v529_v63  ;;  %v369_v58 = vshll.u32 %v4275_v18, 16  ;;  %v542_v2 = vshrl.u32 %v4280_v17, 16  ;;  %5643 = vst [vmem:[#allocation19_spill] sm:$0xff] %v4295_v23  ;;  %v4298_v25 = vld [vmem:[%s4037_s7 + $0x48] sm:$0xf] }
  0x47   : > { %v4290_v33 = vcombine.low %v338_v57, %v348_v49  ;;  %v530_v12 = vsel %vm4076_vm3, %v525_v44, %v529_v63  ;;  %v356_v60 = vor.u32 %v355_v59, %v352_v43  ;;  %v365_v11 = vrot.slane %v363_v9, 4 }
  0x48   : > { %v535_v48 = vrot.slane %v534_v30, 4  ;;  %v371_v36 = vrot.slane %v369_v58, 5  ;;  %v544_v37 = vrot.slane %v542_v2, 4  ;;  %v545_v16 = vshll.u32 %v4280_v17, 16  ;;  %v4309_v30 = vld [vmem:[%s4037_s7 + $0x4c] sm:$0xf] }
  0x49   : > { %5642 = vst [vmem:[#allocation18_spill] sm:$0xff] %v4290_v33  ;;  %3517 = vmatprep.mubr.msk.bf16.mxu0 %vm670_vm2, %v4290_v33  ;;  %v357_v57 = vrot.slane %v356_v60, 4  ;;  %v366_v49 = vor.u32 %v365_v11, %v361_v53  ;;  %v551_v63 = vshll.u32 %v4287_v22, 16  ;;  %v555_v59 = vshrl.u32 %v4287_v22, 16  ;;  %v4317_v33 = vld [vmem:[%s4037_s7 + $0x50] sm:$0x1] }
  0x4a   : > { %v540_v43 = vsel %vm4076_vm3, %v535_v48, %v539_v41  ;;  %v547_v44 = vrot.slane %v545_v16, 5  ;;  %v561_v9 = vshll.u32 %v4295_v23, 16  ;;  %v374_v58 = vshrl.u32 %v4298_v25, 16  ;;  %v4320_v48 = vld [vmem:[%s4037_s7 + $0xa8] sm:$0xf] }
  0x4b   : > { %v4312_v2 = vcombine.low %v530_v12, %v540_v43  ;;  %v362_v60 = vsel %vm4076_vm3, %v357_v57, %v361_v53  ;;  %v367_v11 = vrot.slane %v366_v49, 4  ;;  %v553_v8 = vrot.slane %v551_v63, 5  ;;  %5645 = vst [vmem:[#allocation21_spill] sm:$0xff] %v4320_v48 }
  0x4c   : > { %v548_v62 = vor.u32 %v547_v44, %v544_v37  ;;  %v557_v47 = vrot.slane %v555_v59, 4  ;;  %v563_v41 = vrot.slane %v561_v9, 5  ;;  %v376_v16 = vrot.slane %v374_v58, 4  ;;  %v4333_v44 = vld [vmem:[%s4037_s7 + $0xac] sm:$0xf] }
  0x4d   : > { %5644 = vst [vmem:[#allocation20_spill] sm:$0xff] %v4312_v2  ;;  %3533 = vmatprep.mubr.msk.bf16.mxu1 %vm670_vm2, %v4312_v2  ;;  %v372_v12 = vsel %vm4076_vm3, %v367_v11, %v371_v36  ;;  %v377_v53 = vshll.u32 %v4298_v25, 16  ;;  %v383_v57 = vshll.u32 %v4309_v30, 16  ;;  %v387_v49 = vshrl.u32 %v4309_v30, 16  ;;  %5647 = vst [vmem:[#allocation23_spill] sm:$0xff] %v4333_v44 }
  0x4e   : > { %v4329_v63 = vcombine.low %v362_v60, %v372_v12  ;;  %v549_v37 = vrot.slane %v548_v62, 4  ;;  %v558_v59 = vor.u32 %v557_v47, %v553_v8  ;;  %v393_v43 = vshll.u32 %v4317_v33, 16 }
  0x4f   : > { %v379_v9 = vrot.slane %v377_v53, 5  ;;  %v385_v58 = vrot.slane %v383_v57, 5  ;;  %v389_v2 = vrot.slane %v387_v49, 4  ;;  %v566_v36 = vshrl.u32 %v4320_v48, 16  ;;  %v4346_v49 = vld [vmem:[%s4037_s7 + $0x54] sm:$0xf] }
  0x50   : > { %5646 = vst [vmem:[#allocation22_spill] sm:$0xff] %v4329_v63  ;;  %3518 = vmatmul.mubr.msk.bf16.gmra.mxu0 %vm670_vm2, %v4329_v63  ;;  %v554_v62 = vsel %vm4076_vm3, %v549_v37, %v553_v8  ;;  %v559_v47 = vrot.slane %v558_v59, 4  ;;  %v395_v60 = vrot.slane %v393_v43, 5  ;;  %v569_v11 = vshll.u32 %v4320_v48, 16  ;;  %v4353_v59 = vld [vmem:[%s4037_s7 + $0x58] sm:$0xf] }
  0x51   : > { %v380_v12 = vor.u32 %v379_v9, %v376_v16  ;;  %v390_v55 = vor.u32 %v389_v2, %v385_v58  ;;  %v568_v53 = vrot.slane %v566_v36, 4  ;;  %v575_v57 = vshll.u32 %v4333_v44, 16 }
  0x52   : > { %v564_v63 = vsel %vm4076_vm3, %v559_v47, %v563_v41  ;;  %v571_v34 = vrot.slane %v569_v11, 5  ;;  %v579_v8 = vshrl.u32 %v4333_v44, 16  ;;  %v585_v37 = vshll.u32 %v4336_v35, 16 }
  0x53   : > { %v4355_v2 = vcombine.low %v554_v62, %v564_v63  ;;  %v381_v16 = vrot.slane %v380_v12, 4  ;;  %v391_v43 = vrot.slane %v390_v55, 4  ;;  %v577_v9 = vrot.slane %v575_v57, 5 }
  0x54   : > { %v572_v36 = vor.u32 %v571_v34, %v568_v53  ;;  %v581_v61 = vrot.slane %v579_v8, 4  ;;  %v587_v51 = vrot.slane %v585_v37, 5  ;;  %v398_v41 = vshrl.u32 %v4346_v49, 16  ;;  %v4370_v34 = vld [vmem:[%s4037_s7 + $0xb4] sm:$0xf] }
  0x55   : > { %5649 = vst [vmem:[#allocation25_spill] sm:$0xff] %v4355_v2  ;;  %3534 = vmatmul.mubr.msk.bf16.gmra.mxu1 %vm670_vm2, %v4355_v2  ;;  %v386_v47 = vsel %vm4076_vm3, %v381_v16, %v385_v58  ;;  %v396_v63 = vsel %vm4076_vm3, %v391_v43, %v395_v60  ;;  %v401_v55 = vshll.u32 %v4346_v49, 16  ;;  %v407_v62 = vshll.u32 %v4353_v59, 16  ;;  %5650 = vst [vmem:[#allocation26_spill] sm:$0xff] %v4370_v34  ;;  %v4375_v8 = vld [vmem:[%s4037_s7 + $0xb8] sm:$0xf] }
  0x56   : > { %v4372_v11 = vcombine.low %v386_v47, %v396_v63  ;;  %v573_v12 = vrot.slane %v572_v36, 4  ;;  %v582_v53 = vor.u32 %v581_v61, %v577_v9  ;;  %v400_v57 = vrot.slane %v398_v41, 4 }
  0x57   : > { %v403_v37 = vrot.slane %v401_v55, 5  ;;  %v409_v2 = vrot.slane %v407_v62, 5  ;;  %v411_v58 = vshrl.u32 %v4353_v59, 16  ;;  %v417_v60 = vshll.u32 %v4358_v45, 16  ;;  %v4386_v55 = vld [vmem:[%s4037_s7 + $0xbc] sm:$0x1] }
  0x58   : > { %5651 = vst [vmem:[#allocation27_spill] sm:$0xff] %v4372_v11  ;;  %3521 = vmatprep.mubr.msk.bf16.mxu0 %vm670_vm2, %v4372_v11  ;;  %v578_v16 = vsel %vm4076_vm3, %v573_v12, %v577_v9  ;;  %v583_v43 = vrot.slane %v582_v53, 4  ;;  %v590_v36 = vshrl.u32 %v4370_v34, 16  ;;  %v593_v61 = vshll.u32 %v4370_v34, 16 }
  0x59   : > { %v404_v41 = vor.u32 %v403_v37, %v400_v57  ;;  %v413_v47 = vrot.slane %v411_v58, 4  ;;  %v419_v63 = vrot.slane %v417_v60, 5  ;;  %v599_v62 = vshll.u32 %v4375_v8, 16 }
  0x5a   : > { %v588_v35 = vsel %vm4076_vm3, %v583_v43, %v587_v51  ;;  %v592_v48 = vrot.slane %v590_v36, 4  ;;  %v595_v11 = vrot.slane %v593_v61, 5  ;;  %v603_v44 = vshrl.u32 %v4375_v8, 16 }
  0x5b   : > { %v4392_v9 = vcombine.low %v578_v16, %v588_v35  ;;  %v405_v12 = vrot.slane %v404_v41, 4  ;;  %v414_v53 = vor.u32 %v413_v47, %v409_v2  ;;  %v601_v23 = vrot.slane %v599_v62, 5 }
  0x5c   : > { %v596_v34 = vor.u32 %v595_v11, %v592_v48  ;;  %v605_v57 = vrot.slane %v603_v44, 4  ;;  %v609_v37 = vshll.u32 %v4386_v55, 16  ;;  %v3174_v51 = vrot.slane %v4040_v3, 9 }
  0x5d   : > { %3537 = vmatprep.mubr.msk.bf16.mxu1 %vm670_vm2, %v4392_v9  ;;  %v410_v35 = vsel %vm4076_vm3, %v405_v12, %v409_v2  ;;  %v415_v60 = vrot.slane %v414_v53, 4  ;;  %v1196_v48 = vrot.slane %v4043_v4, 5  ;;  %v4409_v44 = vcombine.low %v4069_v27, %v4072_v28 }
  0x5e   : > { %v597_v11 = vrot.slane %v596_v34, 4  ;;  %v606_v16 = vor.u32 %v605_v57, %v601_v23  ;;  %v611_v43 = vrot.slane %v609_v37, 5  ;;  %v3175_v36 = vrot.slane %v4069_v27, 9 }
  0x5f   : > { %v420_v61 = vsel %vm4076_vm3, %v415_v60, %v419_v63  ;;  %v1197_v41 = vsel %vm4397_vm6, %v3174_v51, %v1196_v48  ;;  %v1198_v47 = vrot.slane %v1196_v48, 4  ;;  %v5654_v2 = vrot.slane %v4072_v28, 5 }
  0x60   : > { %v4418_v12 = vcombine.low %v410_v35, %v420_v61  ;;  %v602_v53 = vsel %vm4076_vm3, %v597_v11, %v601_v23  ;;  %v607_v34 = vrot.slane %v606_v16, 4  ;;  %v5656_v63 = vrot.slane %v4046_v5, 5 }
  0x61   : > { %v1205_v62 = vrot.slane %v5654_v2, 4  ;;  %v5655_v57 = vmov %v5654_v2  ;;  %v5657_v51 = vrot.slane %v4083_v39, 5  ;;  %v4436_v60 = vcombine.low %v4112_v7, %v4121_v20 }
  0x62   : > { %v1204_v27 = vsel %vm4397_vm6, %v3175_v36, %v5655_v57  ;;  %v1200_v37 = vsel %vm4397_vm6, %v1198_v47, %v5656_v63  ;;  %v3176_v23 = vrot.slane %v4112_v7, 9  ;;  %3522 = vmatmul.mubr.msk.bf16.gmra.mxu0 %vm670_vm2, %v4418_v12  ;;  %v612_v5 = vsel %vm4076_vm3, %v607_v34, %v611_v43  ;;  %v4472_v63 = vld [vmem:[%s5579_s1 + $0x30] sm:$0xff]  }
  0x63   : > { %v1207_v35 = vsel %vm4397_vm6, %v1205_v62, %v5657_v51  ;;  %v3192_v28 = vcombine.low %v1197_v41, %v1200_v37  ;;  %v1210_v39 = vrot.slane %v4121_v20, 5  ;;  %v4446_v11 = vcombine.low %v602_v53, %v612_v5 }
  0x64   : > { %v4443_v48 = vcombine.low %v1204_v27, %v1207_v35  ;;  %v1213_v16 = vrot.slane %v4128_v24, 5  ;;  %v1217_v61 = vrot.slane %v4169_v15, 5  ;;  %v3177_v43 = vrot.slane %v4162_v0, 9 }
  0x65   : > { %5658 = vst [vmem:[#allocation28_spill] sm:$0xff] %v4446_v11  ;;  %3577 = vmatprep.mubr.msk.bf16.mxu0 %vm670_vm2, %v3192_v28  ;;  %v1211_v7 = vsel %vm4397_vm6, %v3176_v23, %v1210_v39  ;;  %v1212_v36 = vrot.slane %v1210_v39, 4  ;;  %3538 = vmatmul.mubr.msk.bf16.gmra.mxu1 %vm670_vm2, %v4446_v11  ;;  %v3178_v41 = vrot.slane %v4215_v6, 9  ;;  %v1224_v20 = vrot.slane %v4220_v19, 5 }
  0x66   : > { %v5659_v24 = vcombine.low %v4040_v3, %v4043_v4  ;;  %v1219_v2 = vrot.slane %v1217_v61, 4  ;;  %v1220_v62 = vrot.slane %v4182_v26, 5  ;;  %v1227_v53 = vrot.slane %v4225_v31, 5 }
  0x67   : > { %v1214_v47 = vsel %vm4397_vm6, %v1212_v36, %v1213_v16  ;;  %v1226_v57 = vrot.slane %v1224_v20, 4  ;;  %v1231_v27 = vrot.slane %v4263_v52, 5  ;;  %v1218_v3 = vsel %vm4397_vm6, %v3177_v43, %v1217_v61  ;;  %v4495_v16 = vld [vmem:[%s5579_s1 + $0x28] sm:$0xff]  }
  0x68   : > { %3543 = vmatprep.mubr.msk.bf16.mxu1 %vm670_vm2, %v5659_v24  ;;  %v4466_v34 = vcombine.low %v1211_v7, %v1214_v47  ;;  %v1225_v4 = vsel %vm4397_vm6, %v3178_v41, %v1224_v20  ;;  %v1238_v26 = vrot.slane %v4309_v30, 5  ;;  %v1221_v31 = vsel %vm4397_vm6, %v1219_v2, %v1220_v62 }
  0x69   : > { %v1228_v37 = vsel %vm4397_vm6, %v1226_v57, %v1227_v53  ;;  %v3179_v51 = vrot.slane %v4258_v42, 9  ;;  %v1234_v35 = vrot.slane %v4275_v18, 5  ;;  %v1233_v23 = vrot.slane %v1231_v27, 4 }
  0x6a   : > { %3578 = vmatmul.mubr.msk.bf16.vlgmr.msra.gmra.mxu0 %vm670_vm2, %v4443_v48  ;;  %v3180_v5 = vrot.slane %v4298_v25, 9  ;;  %v1240_v28 = vrot.slane %v1238_v26, 4  ;;  %v1241_v39 = vrot.slane %v4317_v33, 5  ;;  %v4505_v18 = vcombine.low %v1225_v4, %v1228_v37 }
  0x6b   : > { %3644 = vmatpush3.bf16.msra.mxu0 %v4143_v40  ;;  %3581 = vmatprep.mubr.msk.bf16.mxu0 %vm670_vm2, %v4466_v34  ;;  %v4503_v40 = vcombine.low %v1218_v3, %v1221_v31  ;;  %v1232_v33 = vsel %vm4397_vm6, %v3179_v51, %v1231_v27  ;;  %v1235_v7 = vsel %vm4397_vm6, %v1233_v23, %v1234_v35  ;;  %v1255_v43 = vrot.slane %v4061_v14, 5 }
  0x6c   : > { %3711 = vmatprep.subr.bf16.mxu0 %v4472_v63  ;;  %v1239_v36 = vsel %vm4397_vm6, %v3180_v5, %v1238_v26  ;;  %v1242_v61 = vsel %vm4397_vm6, %v1240_v28, %v1241_v39  ;;  %v3181_v41 = vrot.slane %v4346_v49, 9  ;;  %v3182_v20 = vrot.slane %v4053_v10, 9  ;;  %v5660_v5 = vld [vmem:[#allocation19_spill] sm:$0xff] }
  0x6d   : > { %3544 = vmatmul.mubr.msk.bf16.vlgmr.msra.gmra.mxu1 %vm670_vm2, %v4409_v44  ;;  %v1252_v24 = vrot.slane %v4058_v13, 5  ;;  %v4523_v47 = vcombine.low %v4162_v0, %v4169_v15  ;;  %v4527_v2 = vcombine.low %v4215_v6, %v4220_v19  ;;  %v4531_v62 = vcombine.low %v4258_v42, %v4263_v52  ;;  %v5661_v39 = vld [vmem:[#allocation23_spill] sm:$0xff] }
  0x6e   : > { %3610 = vmatpush3.bf16.msra.mxu1 %v4177_v21  ;;  %3547 = vmatprep.mubr.msk.bf16.mxu1 %vm670_vm2, %v4436_v60  ;;  %v1245_v21 = vrot.slane %v4353_v59, 5  ;;  %v4535_v14 = vcombine.low %v4298_v25, %v4309_v30  ;;  %v4539_v53 = vcombine.low %v1232_v33, %v1235_v7  ;;  %v4541_v57 = vcombine.low %v1239_v36, %v1242_v61  ;;  %v5662_v33 = vld [vmem:[#allocation21_spill] sm:$0xff] }
  0x6f   : > { %3677 = vmatprep.subr.bf16.mxu1 %v4495_v16  ;;  %v1248_v0 = vrot.slane %v4358_v45, 5  ;;  %v4546_v15 = vcombine.low %v4190_v38, %v4197_v46  ;;  %v3185_v19 = vrot.slane %v4190_v38, 9  ;;  %v1273_v42 = vrot.slane %v4197_v46, 5 }
  0x70   : > { %v1247_v6 = vrot.slane %v1245_v21, 4  ;;  %v1276_v52 = vrot.slane %v4206_v54, 5  ;;  %v1246_v25 = vsel %vm4397_vm6, %v3181_v41, %v1245_v21  ;;  %v1253_v45 = vsel %vm4397_vm6, %v3182_v20, %v1252_v24  ;;  %v5663_v21 = vld [vmem:[#allocation24_spill] sm:$0xff] }
  0x71   : > { %v1254_v30 = vrot.slane %v1252_v24, 4  ;;  %v4559_v27 = vcombine.low %v4230_v32, %v4239_v1  ;;  %v1274_v38 = vsel %vm4397_vm6, %v3185_v19, %v1273_v42  ;;  %v1275_v46 = vrot.slane %v1273_v42, 4 }
  0x72   : > { %3582 = vmatmul.mubr.msk.bf16.gmra.mxu0 %vm670_vm2, %v4503_v40  ;;  %v3186_v54 = vrot.slane %v4230_v32, 9  ;;  %v1280_v3 = vrot.slane %v4239_v1, 5  ;;  %v1259_v4 = vrot.slane %v4098_v56, 5  ;;  %v1283_v26 = vrot.slane %v4246_v50, 5 }
  0x73   : > { %3585 = vmatprep.mubr.msk.bf16.mxu0 %vm670_vm2, %v4505_v18  ;;  %v4573_v31 = vcombine.low %v4280_v17, %v4287_v22  ;;  %v3187_v37 = vrot.slane %v4280_v17, 9  ;;  %v1249_v51 = vsel %vm4397_vm6, %v1247_v6, %v1248_v0  ;;  %v1277_v32 = vsel %vm4397_vm6, %v1275_v46, %v1276_v52  ;;  %v5664_v0 = vld [vmem:[#allocation26_spill] sm:$0xff] }
  0x74   : > { %v1281_v1 = vsel %vm4397_vm6, %v3186_v54, %v1280_v3  ;;  %v1282_v35 = vrot.slane %v1280_v3, 4  ;;  %v4582_v23 = vcombine.low %v1274_v38, %v1277_v32  ;;  %v1287_v50 = vrot.slane %v4287_v22, 5  ;;  %v5665_v54 = vld [vmem:[#allocation11_spill] sm:$0xff] }
  0x75   : > { %3548 = vmatmul.mubr.msk.bf16.gmra.mxu1 %vm670_vm2, %v4523_v47  ;;  %v1290_v28 = vrot.slane %v5660_v5, 5  ;;  %v4588_v7 = vcombine.low %v5662_v33, %v5661_v39  ;;  %v3188_v36 = vrot.slane %v5662_v33, 9  ;;  %v1294_v61 = vrot.slane %v5661_v39, 5  ;;  %v5667_v39 = vld [vmem:[#allocation7_spill] sm:$0xff] }
  0x76   : > { %3551 = vmatprep.mubr.msk.bf16.mxu1 %vm670_vm2, %v4527_v2  ;;  %v1284_v17 = vsel %vm4397_vm6, %v1282_v35, %v1283_v26  ;;  %v1297_v41 = vrot.slane %v5663_v21, 5  ;;  %v1288_v22 = vsel %vm4397_vm6, %v3187_v37, %v1287_v50  ;;  %v1289_v24 = vrot.slane %v1287_v50, 4 }
  0x77   : > { %v4597_v20 = vcombine.low %v1281_v1, %v1284_v17  ;;  %v4603_v6 = vcombine.low %v5664_v0, %v4375_v8  ;;  %v1295_v19 = vsel %vm4397_vm6, %v3188_v36, %v1294_v61  ;;  %v1296_v42 = vrot.slane %v1294_v61, 4  ;;  %v5668_v36 = vld [vmem:[#allocation9_spill] sm:$0xff] }
  0x78   : > { %v3189_v52 = vrot.slane %v5664_v0, 9  ;;  %v1301_v38 = vrot.slane %v4375_v8, 5  ;;  %v1256_v46 = vsel %vm4397_vm6, %v1254_v30, %v1255_v43  ;;  %v1266_v3 = vrot.slane %v5665_v54, 5  ;;  %v5666_v30 = vld [vmem:[#allocation6_spill] sm:$0xff] }
  0x79   : > { %v1291_v26 = vsel %vm4397_vm6, %v1289_v24, %v1290_v28  ;;  %v1304_v37 = vrot.slane %v4386_v55, 5  ;;  %v1298_v1 = vsel %vm4397_vm6, %v1296_v42, %v1297_v41  ;;  %v4627_v43 = vcombine.low %v1246_v25, %v1249_v51  ;;  %v5669_v41 = vld [vmem:[#allocation12_spill] sm:$0xff] }
  0x7a   : > { %3586 = vmatmul.mubr.msk.bf16.gmra.mxu0 %vm670_vm2, %v4539_v53  ;;  %v4619_v32 = vcombine.low %v1288_v22, %v1291_v26  ;;  %v1302_v8 = vsel %vm4397_vm6, %v3189_v52, %v1301_v38  ;;  %v1303_v35 = vrot.slane %v1301_v38, 4  ;;  %v3183_v50 = vrot.slane %v5666_v30, 9  ;;  %v4706_v52 = vld [vmem:[%s4037_s7 + $0xc0] sm:$0xf]  ;;  %v220_v38 = vld [vmem:[%s4037_s7 + $0xc8] sm:$0x1] }
  0x7b   : > { %3589 = vmatprep.mubr.msk.bf16.mxu0 %vm670_vm2, %v4541_v57  ;;  %v4630_v55 = vcombine.low %v1295_v19, %v1298_v1  ;;  %v4632_v5 = vcombine.low %v1253_v45, %v1256_v46  ;;  %v1261_v28 = vrot.slane %v1259_v4, 4  ;;  %v1262_v33 = vrot.slane %v5667_v39, 5  ;;  %v5670_v1 = vld [vmem:[#allocation10_spill] sm:$0xff]  ;;  %v5675_v39 = vld [vmem:[#allocation27_spill] sm:$0xff] }
  0x7c   : > { %v1305_v17 = vsel %vm4397_vm6, %v1303_v35, %v1304_v37  ;;  %v3184_v61 = vrot.slane %v5668_v36, 9  ;;  %v1268_v21 = vrot.slane %v1266_v3, 4  ;;  %v1269_v22 = vrot.slane %v5669_v41, 5  ;;  %v3882_v35 = vld [vmem:[%s5579_s1 + $0x40] sm:$0xff]  }
  0x7d   : > { %3552 = vmatmul.mubr.msk.bf16.gmra.mxu1 %vm670_vm2, %v4531_v62  ;;  %v4639_v24 = vcombine.low %v1302_v8, %v1305_v17  ;;  %v4643_v25 = vcombine.low %v4346_v49, %v4353_v59  ;;  %v4649_v45 = vcombine.low %v4053_v10, %v4058_v13  ;;  %v1260_v51 = vsel %vm4397_vm6, %v3183_v50, %v1259_v4  ;;  %v5672_v50 = vld [vmem:[#allocation16_spill] sm:$0xff]  ;;  %v5678_v17 = vld [vmem:[#allocation15_spill] sm:$0xff] }
  0x7e   : > { %3555 = vmatprep.mubr.msk.bf16.mxu1 %vm670_vm2, %v4535_v14  ;;  %v1263_v0 = vsel %vm4397_vm6, %v1261_v28, %v1262_v33  ;;  %v1267_v49 = vsel %vm4397_vm6, %v3184_v61, %v1266_v3  ;;  %v1270_v59 = vsel %vm4397_vm6, %v1268_v21, %v1269_v22  ;;  %v4671_v4 = vcombine.low %v5666_v30, %v4098_v56  ;;  %v4700_v56 = vld [vmem:[%s4037_s7 + $0xc4] sm:$0xf]  ;;  %v5671_v30 = vld [vmem:[#allocation14_spill] sm:$0xff]  ;;  %v3881_v28 = vld [vmem:[%s5579_s1 + $0x38] sm:$0xff]  }
  0x7f   : > { %v4665_v10 = vcombine.low %v1260_v51, %v1263_v0  ;;  %v4667_v13 = vcombine.low %v1267_v49, %v1270_v59  ;;  %v4677_v19 = vcombine.low %v5668_v36, %v5665_v54  ;;  %v2049_v42 = vrot.slane %v4700_v56, 5  ;;  %v5677_v33 = vld [vmem:[#allocation13_spill] sm:$0xff] }
  0x80   : > { %v3265_v46 = vrot.slane %v4706_v52, 9  ;;  %v2052_v3 = vrot.slane %v220_v38, 5  ;;  %v5679_v36 = vld [vmem:[#allocation17_spill] sm:$0xff]  ;;  %v1815_v61 = vshrl.u32 %v4706_v52, 16  ;;  %v1818_v21 = vshll.u32 %v4706_v52, 16 }
  0x81   : > { %v2051_v54 = vrot.slane %v2049_v42, 4  ;;  %v1828_v41 = vshrl.u32 %v4700_v56, 16  ;;  %v1824_v22 = vshll.u32 %v4700_v56, 16 }
  0x82   : > { %3590 = vmatmul.mubr.msk.bf16.gmra.mxu0 %vm670_vm2, %v4627_v43  ;;  %v2050_v26 = vsel %vm4397_vm6, %v3265_v46, %v2049_v42  ;;  %v1817_v51 = vrot.slane %v1815_v61, 4  ;;  %v1820_v0 = vrot.slane %v1818_v21, 5  ;;  %v5680_v42 = vld [vmem:[#allocation20_spill] sm:$0xff]  ;;  %v5681_v46 = vld [vmem:[#allocation25_spill] sm:$0xff] }
  0x83   : > { %3593 = vmatprep.mubr.msk.bf16.mxu0 %vm670_vm2, %v4632_v5  ;;  %v2053_v37 = vsel %vm4397_vm6, %v2051_v54, %v2052_v3  ;;  %v1826_v49 = vrot.slane %v1824_v22, 5  ;;  %v1830_v59 = vrot.slane %v1828_v41, 4  ;;  %v3227_v22 = vcombine.low %v4706_v52, %v4700_v56 }
  0x84   : > { %v4718_v8 = vcombine.low %v2050_v26, %v2053_v37  ;;  %v1821_v54 = vor.u32 %v1820_v0, %v1817_v51  ;;  %v1834_v26 = vshll.u32 %v220_v38, 16 }
  0x85   : > { %3556 = vmatmul.mubr.msk.bf16.gmra.mxu1 %vm670_vm2, %v4643_v25  ;;  %v1831_v3 = vor.u32 %v1830_v59, %v1826_v49 }
  0x86   : > { %3559 = vmatprep.mubr.msk.bf16.mxu1 %vm670_vm2, %v4649_v45  ;;  %v1822_v37 = vrot.slane %v1821_v54, 4  ;;  %v1836_v61 = vrot.slane %v1834_v26, 5  ;;  %v4904_v54 = vld [vmem:[%s4037_s7 + $0xd0] sm:$0xf] }
  0x88   : > { %v1827_v21 = vsel %vm4076_vm3, %v1822_v37, %v1826_v49 }
  0x8a   : > { %3594 = vmatmul.mubr.msk.bf16.gmra.mxu0 %vm670_vm2, %v4665_v10 }
  0x8b   : > { %3597 = vmatprep.mubr.msk.bf16.mxu0 %vm670_vm2, %v4667_v13 }
  0x8d   : > { %3560 = vmatmul.mubr.msk.bf16.gmra.mxu1 %vm670_vm2, %v4671_v4 }
  0x8e   : > { %3563 = vmatprep.mubr.msk.bf16.mxu1 %vm670_vm2, %v4677_v19 }
  0x92   : > { %3598 = vmatmul.mubr.msk.bf16.gmra.mxu0 %vm670_vm2, %v4582_v23 }
  0x93   : > { %3601 = vmatprep.mubr.msk.bf16.mxu0 %vm670_vm2, %v4597_v20 }
  0x95   : > { %3564 = vmatmul.mubr.msk.bf16.gmra.mxu1 %vm670_vm2, %v4546_v15 }
  0x96   : > { %3567 = vmatprep.mubr.msk.bf16.mxu1 %vm670_vm2, %v4559_v27 }
  0x9a   : > { %3602 = vmatmul.mubr.msk.bf16.gmra.mxu0 %vm670_vm2, %v4619_v32 }
  0x9b   : > { %3605 = vmatprep.mubr.msk.bf16.mxu0 %vm670_vm2, %v4630_v55 }
  0x9d   : > { %3568 = vmatmul.mubr.msk.bf16.gmra.mxu1 %vm670_vm2, %v4573_v31 }
  0x9e   : > { %3571 = vmatprep.mubr.msk.bf16.mxu1 %vm670_vm2, %v4588_v7 }
  0xa2   : > { %3606 = vmatmul.mubr.msk.bf16.gmra.mxu0 %vm670_vm2, %v4639_v24 }
  0xa3   : > { %3645 = vmatprep.mubr.msk.bf16.mxu0 %vm670_vm2, %v5670_v1  ;;  %v1832_v1 = vrot.slane %v1831_v3, 4 }
  0xa5   : > { %3572 = vmatmul.mubr.msk.bf16.gmra.mxu1 %vm670_vm2, %v4603_v6  ;;  %v1837_v38 = vsel %vm4076_vm3, %v1832_v1, %v1836_v61 }
  0xa6   : > { %3611 = vmatprep.mubr.msk.bf16.mxu1 %vm670_vm2, %v4409_v44  ;;  %v5673_v44 = vld [vmem:[#allocation18_spill] sm:$0xff]  ;;  %v4796_v41 = vcombine.low %v1827_v21, %v1837_v38 }
  0xa8   : > { %5682 = vst [vmem:[#allocation19_spill] sm:$0xff] %v4796_v41 }
  0xaa   : > { %3646 = vmatmul.mubr.msk.bf16.vlgmr.msra.gmra.mxu0 %vm670_vm2, %v5671_v30 }
  0xab   : > { %3712 = vmatpush3.bf16.msra.mxu0 %v4472_v63  ;;  %3649 = vmatprep.mubr.msk.bf16.mxu0 %vm670_vm2, %v5672_v50  ;;  %v5674_v63 = vld [vmem:[#allocation22_spill] sm:$0xff] }
  0xac   : > { %3779 = vmatprep.subr.bf16.mxu0 %v3882_v35 }
  0xad   : > { %3612 = vmatmul.mubr.msk.bf16.vlgmr.msra.gmra.mxu1 %vm670_vm2, %v4436_v60 }
  0xae   : > { %3678 = vmatpush3.bf16.msra.mxu1 %v4495_v16  ;;  %3615 = vmatprep.mubr.msk.bf16.mxu1 %vm670_vm2, %v4523_v47  ;;  %v5676_v16 = vld [vmem:[#allocation8_spill] sm:$0xff] }
  0xaf   : > { %3745 = vmatprep.subr.bf16.mxu1 %v3881_v28 }
  0xb2   : > { %3650 = vmatmul.mubr.msk.bf16.gmra.mxu0 %vm670_vm2, %v5673_v44 }
  0xb3   : > { %3653 = vmatprep.mubr.msk.bf16.mxu0 %vm670_vm2, %v5674_v63 }
  0xb5   : > { %3616 = vmatmul.mubr.msk.bf16.gmra.mxu1 %vm670_vm2, %v4527_v2 }
  0xb6   : > { %3619 = vmatprep.mubr.msk.bf16.mxu1 %vm670_vm2, %v4531_v62 }
  0xba   : > { %3654 = vmatmul.mubr.msk.bf16.gmra.mxu0 %vm670_vm2, %v5675_v39 }
  0xbb   : > { %3657 = vmatprep.mubr.msk.bf16.mxu0 %vm670_vm2, %v4418_v12 }
  0xbd   : > { %3620 = vmatmul.mubr.msk.bf16.gmra.mxu1 %vm670_vm2, %v4535_v14 }
  0xbe   : > { %3623 = vmatprep.mubr.msk.bf16.mxu1 %vm670_vm2, %v4643_v25 }
  0xc2   : > { %3658 = vmatmul.mubr.msk.bf16.gmra.mxu0 %vm670_vm2, %v5676_v16 }
  0xc3   : > { %3661 = vmatprep.mubr.msk.bf16.mxu0 %vm670_vm2, %v5677_v33 }
  0xc5   : > { %3624 = vmatmul.mubr.msk.bf16.gmra.mxu1 %vm670_vm2, %v4649_v45 }
  0xc6   : > { %3627 = vmatprep.mubr.msk.bf16.mxu1 %vm670_vm2, %v4671_v4 }
  0xca   : > { %3662 = vmatmul.mubr.msk.bf16.gmra.mxu0 %vm670_vm2, %v5678_v17 }
  0xcb   : > { %3665 = vmatprep.mubr.msk.bf16.mxu0 %vm670_vm2, %v5679_v36 }
  0xcd   : > { %3628 = vmatmul.mubr.msk.bf16.gmra.mxu1 %vm670_vm2, %v4677_v19 }
  0xce   : > { %3631 = vmatprep.mubr.msk.bf16.mxu1 %vm670_vm2, %v4546_v15 }
  0xd2   : > { %3666 = vmatmul.mubr.msk.bf16.gmra.mxu0 %vm670_vm2, %v5680_v42 }
  0xd3   : > { %3669 = vmatprep.mubr.msk.bf16.mxu0 %vm670_vm2, %v5681_v46 }
  0xd5   : > { %3632 = vmatmul.mubr.msk.bf16.gmra.mxu1 %vm670_vm2, %v4559_v27 }
  0xd6   : > { %3635 = vmatprep.mubr.msk.bf16.mxu1 %vm670_vm2, %v4573_v31 }
  0xda   : > { %3670 = vmatmul.mubr.msk.bf16.gmra.mxu0 %vm670_vm2, %v4392_v9 }
  0xdb   : > { %3673 = vmatprep.mubr.msk.bf16.mxu0 %vm670_vm2, %v4446_v11 }
  0xdd   : > { %3636 = vmatmul.mubr.msk.bf16.gmra.mxu1 %vm670_vm2, %v4588_v7 }
  0xde   : > { %3639 = vmatprep.mubr.msk.bf16.mxu1 %vm670_vm2, %v4603_v6 }
  0xe2   : > { %3674 = vmatmul.mubr.msk.bf16.gmra.mxu0 %vm670_vm2, %v4796_v41 }
  0xe3   : > { %3713 = vmatprep.mubr.msk.bf16.mxu0 %vm670_vm2, %v4436_v60 }
  0xe5   : > { %3640 = vmatmul.mubr.msk.bf16.gmra.mxu1 %vm670_vm2, %v3227_v22 }
  0xe6   : > { %3679 = vmatprep.mubr.msk.bf16.mxu1 %vm670_vm2, %v4443_v48 }
  0xea   : > { %3714 = vmatmul.mubr.msk.bf16.vlgmr.msra.gmra.mxu0 %vm670_vm2, %v4523_v47 }
  0xeb   : > { %3780 = vmatpush3.bf16.msra.mxu0 %v3882_v35  ;;  %3717 = vmatprep.mubr.msk.bf16.mxu0 %vm670_vm2, %v4527_v2 }
  0xed   : > { %3680 = vmatmul.mubr.msk.bf16.vlgmr.msra.gmra.mxu1 %vm670_vm2, %v4466_v34 }
  0xee   : > { %3746 = vmatpush3.bf16.msra.mxu1 %v3881_v28  ;;  %3683 = vmatprep.mubr.msk.bf16.mxu1 %vm670_vm2, %v4503_v40  ;;  %v4817_v60 = vpop.f32.mrf.mxu0 }
  0xf0   : > { %v4827_v47 = vpop.f32.mrf.mxu0 }
  0xf2   : > { %3718 = vmatmul.mubr.msk.bf16.gmra.mxu0 %vm670_vm2, %v4531_v62  ;;  %v4833_v62 = vpop.f32.mrf.mxu0 }
  0xf3   : > { %3721 = vmatprep.mubr.msk.bf16.mxu0 %vm670_vm2, %v4535_v14  ;;  %v4823_v48 = vpop.f32.mrf.mxu1 }
  0xf4   : > { %v4843_v56 = vpop.f32.mrf.mxu0 }
  0xf5   : > { %3684 = vmatmul.mubr.msk.bf16.gmra.mxu1 %vm670_vm2, %v4505_v18  ;;  %v4829_v2 = vpop.f32.mrf.mxu1 }
  0xf6   : > { %3687 = vmatprep.mubr.msk.bf16.mxu1 %vm670_vm2, %v4539_v53 }
  0xf7   : > { %v4839_v14 = vpop.f32.mrf.mxu1 }
  0xf9   : > { %v4845_v52 = vpop.f32.mrf.mxu1 }
  0xfa   : > { %3722 = vmatmul.mubr.msk.bf16.gmra.mxu0 %vm670_vm2, %v4643_v25 }
  0xfb   : > { %3725 = vmatprep.mubr.msk.bf16.mxu0 %vm670_vm2, %v4649_v45 }
  0xfd   : > { %3688 = vmatmul.mubr.msk.bf16.gmra.mxu1 %vm670_vm2, %v4541_v57 }
  0xfe   : > { %3691 = vmatprep.mubr.msk.bf16.mxu1 %vm670_vm2, %v4627_v43 }
  0xff   : > { %v4849_v25 = vpop.f32.mrf.mxu0 }
 0x101   : > { %v4859_v35 = vpop.f32.mrf.mxu0 }
 0x102   : > { %3726 = vmatmul.mubr.msk.bf16.gmra.mxu0 %vm670_vm2, %v4671_v4 }
 0x103   : > { %3729 = vmatprep.mubr.msk.bf16.mxu0 %vm670_vm2, %v4677_v19  ;;  %v4855_v45 = vpop.f32.mrf.mxu1  ;;  %v4865_v4 = vpop.f32.mrf.mxu0 }
 0x105   : > { %3692 = vmatmul.mubr.msk.bf16.gmra.mxu1 %vm670_vm2, %v4632_v5  ;;  %v4861_v28 = vpop.f32.mrf.mxu1  ;;  %v4875_v51 = vpop.f32.mrf.mxu0 }
 0x106   : > { %3695 = vmatprep.mubr.msk.bf16.mxu1 %vm670_vm2, %v4665_v10 }
 0x107   : > { %v4871_v19 = vpop.f32.mrf.mxu1 }
 0x109   : > { %v4877_v0 = vpop.f32.mrf.mxu1 }
 0x10a   : > { %3730 = vmatmul.mubr.msk.bf16.gmra.mxu0 %vm670_vm2, %v4546_v15 }
 0x10b   : > { %3733 = vmatprep.mubr.msk.bf16.mxu0 %vm670_vm2, %v4559_v27 }
 0x10d   : > { %3696 = vmatmul.mubr.msk.bf16.gmra.mxu1 %vm670_vm2, %v4667_v13 }
 0x10e   : > { %3699 = vmatprep.mubr.msk.bf16.mxu1 %vm670_vm2, %v4582_v23 }
 0x110   : > { %v4881_v15 = vpop.f32.mrf.mxu0 }
 0x112   : > { %3734 = vmatmul.mubr.msk.bf16.gmra.mxu0 %vm670_vm2, %v4573_v31  ;;  %v4891_v49 = vpop.f32.mrf.mxu0 }
 0x113   : > { %3737 = vmatprep.mubr.msk.bf16.mxu0 %vm670_vm2, %v4588_v7  ;;  %v4901_v7 = vld [vmem:[%s4037_s7 + $0xcc] sm:$0xf] }
 0x114   : > { %v4897_v31 = vpop.f32.mrf.mxu0 }
 0x115   : > { %3700 = vmatmul.mubr.msk.bf16.gmra.mxu1 %vm670_vm2, %v4597_v20  ;;  %v4887_v27 = vpop.f32.mrf.mxu1 }
 0x116   : > { %5683 = vst [vmem:[#allocation23_spill] sm:$0xff] %v4887_v27  ;;  %3703 = vmatprep.mubr.msk.bf16.mxu1 %vm670_vm2, %v4619_v32  ;;  %v4910_v26 = vpop.f32.mrf.mxu0 }
 0x117   : > { %v4893_v59 = vpop.f32.mrf.mxu1 }
 0x118   : > { %5684 = vst [vmem:[#allocation21_spill] sm:$0xff] %v4893_v59 }
 0x119   : > { %v4908_v3 = vpop.f32.mrf.mxu1 }
 0x11a   : > { %3738 = vmatmul.mubr.msk.bf16.gmra.mxu0 %vm670_vm2, %v4603_v6  ;;  %5685 = vst [vmem:[#allocation24_spill] sm:$0xff] %v4908_v3  ;;  %v3288_v6 = vcombine.low %v4901_v7, %v4904_v54 }
 0x11b   : > { %3741 = vmatprep.mubr.msk.bf16.mxu0 %vm670_vm2, %v3227_v22  ;;  %v4916_v37 = vpop.f32.mrf.mxu1 }
 0x11c   : > { %5686 = vst [vmem:[#allocation26_spill] sm:$0xff] %v4916_v37 }
 0x11d   : > { %3704 = vmatmul.mubr.msk.bf16.gmra.mxu1 %vm670_vm2, %v4630_v55 }
 0x11e   : > { %3707 = vmatprep.mubr.msk.bf16.mxu1 %vm670_vm2, %v4639_v24 }
 0x122   : > { %v4918_v1 = vpop.f32.mrf.mxu0  ;;  %3742 = vmatmul.mubr.msk.bf16.gmra.mxu0 %vm670_vm2, %v3288_v6 }
 0x123   : > { %3781 = vmatprep.mubr.msk.bf16.mxu0 %vm670_vm2, %v4466_v34 }
 0x124   : > { %v4923_v61 = vpop.f32.mrf.mxu0 }
 0x125   : > { %v4925_v21 = vpop.f32.mrf.mxu1  ;;  %3708 = vmatmul.mubr.msk.bf16.gmra.mxu1 %vm670_vm2, %v4718_v8 }
 0x126   : > { %5687 = vst [vmem:[#allocation11_spill] sm:$0xff] %v4925_v21  ;;  %v4929_v38 = vpop.f32.mrf.mxu0  ;;  %3747 = vmatprep.mubr.msk.bf16.mxu1 %vm670_vm2, %v5671_v30 }
 0x127   : > { %v4933_v22 = vpop.f32.mrf.mxu1 }
 0x128   : > { %5688 = vst [vmem:[#allocation6_spill] sm:$0xff] %v4933_v22  ;;  %v4935_v37 = vpop.f32.mrf.mxu0 }
 0x129   : > { %v4937_v6 = vpop.f32.mrf.mxu1 }
 0x12a   : > { %5689 = vst [vmem:[#allocation7_spill] sm:$0xff] %v4937_v6  ;;  %v3579_v3 = vpop.f32.mrf.mxu0  ;;  %3782 = vmatmul.mubr.msk.bf16.vlgmr.msra.gmra.mxu0 %vm670_vm2, %v4503_v40 }
 0x12b   : > { %v4941_v34 = vpop.f32.mrf.mxu1  ;;  %3785 = vmatprep.mubr.msk.bf16.mxu0 %vm670_vm2, %v4505_v18 }
 0x12c   : > { %5690 = vst [vmem:[#allocation9_spill] sm:$0xff] %v4941_v34  ;;  %v1445_v21 = vpop.f32.mrf.mxu0 }
 0x12d   : > { %v3545_v59 = vpop.f32.mrf.mxu1  ;;  %3748 = vmatmul.mubr.msk.bf16.vlgmr.msra.gmra.mxu1 %vm670_vm2, %v5672_v50 }
 0x12e   : > { %v1057_v30 = vadd.f32 %v3545_v59, %v4817_v60  ;;  %v3580_v22 = vpop.f32.mrf.mxu0  ;;  %3751 = vmatprep.mubr.msk.bf16.mxu1 %vm670_vm2, %v5673_v44 }
 0x12f   : > { %v1048_v6 = vpop.f32.mrf.mxu1 }
 0x130   : > { %v4950_v41 = vadd.f32 %v3579_v3, %v1057_v30  ;;  %v1049_v40 = vadd.f32 %v1048_v6, %v4827_v47  ;;  %v1448_v34 = vpop.f32.mrf.mxu0 }
 0x131   : > { %v3546_v27 = vpop.f32.mrf.mxu1 }
 0x132   : > { %v4953_v29 = vadd.f32 %v1445_v21, %v1049_v40  ;;  %v1060_v18 = vadd.f32 %v3546_v27, %v4833_v62  ;;  %v3583_v11 = vpop.f32.mrf.mxu0  ;;  %3786 = vmatmul.mubr.msk.bf16.gmra.mxu0 %vm670_vm2, %v4539_v53 }
 0x133   : > { %v1051_v50 = vpop.f32.mrf.mxu1  ;;  %3789 = vmatprep.mubr.msk.bf16.mxu0 %vm670_vm2, %v4541_v57 }
 0x134   : > { %v4960_v44 = vadd.f32 %v3580_v22, %v1060_v18  ;;  %v1052_v60 = vadd.f32 %v1051_v50, %v4843_v56  ;;  %v1461_v59 = vpop.f32.mrf.mxu0 }
 0x135   : > { %v3549_v47 = vpop.f32.mrf.mxu1  ;;  %3752 = vmatmul.mubr.msk.bf16.gmra.mxu1 %vm670_vm2, %v5674_v63 }
 0x136   : > { %v4965_v3 = vadd.f32 %v1448_v34, %v1052_v60  ;;  %v1073_v62 = vadd.f32 %v3549_v47, %v4849_v25  ;;  %v3584_v27 = vpop.f32.mrf.mxu0  ;;  %3755 = vmatprep.mubr.msk.bf16.mxu1 %vm670_vm2, %v5675_v39 }
 0x137   : > { %v1064_v53 = vpop.f32.mrf.mxu1 }
 0x138   : > { %v4970_v21 = vadd.f32 %v3583_v11, %v1073_v62  ;;  %v1065_v57 = vadd.f32 %v1064_v53, %v4859_v35  ;;  %v1464_v22 = vpop.f32.mrf.mxu0 }
 0x139   : > { %v3550_v56 = vpop.f32.mrf.mxu1 }
 0x13a   : > { %v4973_v6 = vadd.f32 %v1461_v59, %v1065_v57  ;;  %v1076_v30 = vadd.f32 %v3550_v56, %v4865_v4  ;;  %v3587_v63 = vpop.f32.mrf.mxu0  ;;  %3790 = vmatmul.mubr.msk.bf16.gmra.mxu0 %vm670_vm2, %v4627_v43 }
 0x13b   : > { %v1067_v25 = vpop.f32.mrf.mxu1  ;;  %3793 = vmatprep.mubr.msk.bf16.mxu0 %vm670_vm2, %v4632_v5 }
 0x13c   : > { %v4980_v39 = vadd.f32 %v3584_v27, %v1076_v30  ;;  %v1068_v11 = vadd.f32 %v1067_v25, %v4875_v51  ;;  %v1477_v34 = vpop.f32.mrf.mxu0 }
 0x13d   : > { %v3553_v35 = vpop.f32.mrf.mxu1  ;;  %3756 = vmatmul.mubr.msk.bf16.gmra.mxu1 %vm670_vm2, %v4418_v12 }
 0x13e   : > { %v4985_v40 = vadd.f32 %v1464_v22, %v1068_v11  ;;  %v1089_v4 = vadd.f32 %v3553_v35, %v4881_v15  ;;  %v3588_v18 = vpop.f32.mrf.mxu0  ;;  %3759 = vmatprep.mubr.msk.bf16.mxu1 %vm670_vm2, %v5676_v16 }
 0x13f   : > { %v1080_v43 = vpop.f32.mrf.mxu1 }
 0x140   : > { %v4990_v50 = vadd.f32 %v3587_v63, %v1089_v4  ;;  %v1081_v5 = vadd.f32 %v1080_v43, %v4891_v49  ;;  %v1480_v60 = vpop.f32.mrf.mxu0 }
 0x141   : > { %v3554_v51 = vpop.f32.mrf.mxu1 }
 0x142   : > { %v4993_v59 = vadd.f32 %v1477_v34, %v1081_v5  ;;  %v1092_v47 = vadd.f32 %v3554_v51, %v4897_v31  ;;  %v3591_v12 = vpop.f32.mrf.mxu0  ;;  %3794 = vmatmul.mubr.msk.bf16.gmra.mxu0 %vm670_vm2, %v4665_v10  ;;  %v2476_v34 = vshll.u32 %v4901_v7, 16 }
 0x143   : > { %v1083_v15 = vpop.f32.mrf.mxu1  ;;  %3797 = vmatprep.mubr.msk.bf16.mxu0 %vm670_vm2, %v4667_v13 }
 0x144   : > { %v5000_v16 = vadd.f32 %v3588_v18, %v1092_v47  ;;  %v1084_v62 = vadd.f32 %v1083_v15, %v4910_v26  ;;  %v1493_v27 = vpop.f32.mrf.mxu0  ;;  %v2478_v51 = vrot.slane %v2476_v34, 5 }
 0x145   : > { %v3557_v49 = vpop.f32.mrf.mxu1  ;;  %3760 = vmatmul.mubr.msk.bf16.gmra.mxu1 %vm670_vm2, %v5677_v33 }
 0x146   : > { %v5005_v53 = vadd.f32 %v1480_v60, %v1084_v62  ;;  %v1105_v31 = vadd.f32 %v3557_v49, %v4918_v1  ;;  %v3592_v57 = vpop.f32.mrf.mxu0  ;;  %3763 = vmatprep.mubr.msk.bf16.mxu1 %vm670_vm2, %v5678_v17 }
 0x147   : > { %v1096_v10 = vpop.f32.mrf.mxu1 }
 0x148   : > { %v5010_v22 = vadd.f32 %v3591_v12, %v1105_v31  ;;  %v1097_v13 = vadd.f32 %v1096_v10, %v4923_v61  ;;  %v1496_v56 = vpop.f32.mrf.mxu0  ;;  %v2473_v61 = vshrl.u32 %v4901_v7, 16 }
 0x149   : > { %v3558_v26 = vpop.f32.mrf.mxu1 }
 0x14a   : > { %v5013_v30 = vadd.f32 %v1493_v27, %v1097_v13  ;;  %v1108_v63 = vadd.f32 %v3558_v26, %v4929_v38  ;;  %v3595_v33 = vpop.f32.mrf.mxu0  ;;  %3798 = vmatmul.mubr.msk.bf16.gmra.mxu0 %vm670_vm2, %v4582_v23  ;;  %v2482_v38 = vshll.u32 %v4904_v54, 16  ;;  %v2486_v23 = vshrl.u32 %v4904_v54, 16 }
 0x14b   : > { %v1099_v1 = vpop.f32.mrf.mxu1  ;;  %3801 = vmatprep.mubr.msk.bf16.mxu0 %vm670_vm2, %v4597_v20 }
 0x14c   : > { %v5020_v17 = vadd.f32 %v3592_v57, %v1108_v63  ;;  %v1100_v25 = vadd.f32 %v1099_v1, %v4935_v37  ;;  %v1509_v11 = vpop.f32.mrf.mxu0  ;;  %v2484_v12 = vrot.slane %v2482_v38, 5  ;;  %v2488_v15 = vrot.slane %v2486_v23, 4 }
 0x14d   : > { %v3561_v35 = vpop.f32.mrf.mxu1  ;;  %3764 = vmatmul.mubr.msk.bf16.gmra.mxu1 %vm670_vm2, %v5679_v36  ;;  %v2475_v36 = vrot.slane %v2473_v61, 4  ;;  %v3326_v63 = vrot.slane %v4901_v7, 9 }
 0x14e   : > { %v5029_v4 = vadd.f32 %v1496_v56, %v1100_v25  ;;  %v1121_v20 = vadd.f32 %v3561_v35, %v4823_v48  ;;  %v3596_v18 = vpop.f32.mrf.mxu0  ;;  %3767 = vmatprep.mubr.msk.bf16.mxu1 %vm670_vm2, %v5680_v42  ;;  %v2707_v42 = vrot.slane %v4904_v54, 5 }
 0x14f   : > { %v1112_v37 = vpop.f32.mrf.mxu1 }
 0x150   : > { %v5034_v43 = vadd.f32 %v3595_v33, %v1121_v20  ;;  %v1113_v5 = vadd.f32 %v1112_v37, %v4829_v2  ;;  %v1512_v60 = vpop.f32.mrf.mxu0  ;;  %v223_v2 = vld [vmem:[%s4037_s7 + $0xd4] sm:$0x1]  ;;  %s3353_s7 = sshll.u32 %s3990_s16, 12  ;;  %s5538_s16 = scalar_lea.sflag [#allocation3], %s161_s29 }
 0x151   : > { %v3562_v47 = vpop.f32.mrf.mxu1  ;;  %v2492_v26 = vshll.u32 %v223_v2, 16  ;;  %v2710_v1 = vrot.slane %v223_v2, 5  ;;  %s5528_s11 = scalar_lea.hbm %s5581_s3, %s3353_s7 }
 0x152   : > { %v5037_v62 = vadd.f32 %v1509_v11, %v1113_v5  ;;  %v1124_v48 = vadd.f32 %v3562_v47, %v4839_v14  ;;  %v3599_v27 = vpop.f32.mrf.mxu0  ;;  %3802 = vmatmul.mubr.msk.bf16.gmra.mxu0 %vm670_vm2, %v4619_v32  ;;  %v2479_v14 = vor.u32 %v2478_v51, %v2475_v36 }
 0x153   : > { %v1115_v49 = vpop.f32.mrf.mxu1  ;;  %3805 = vmatprep.mubr.msk.bf16.mxu0 %vm670_vm2, %v4630_v55  ;;  %v2489_v55 = vor.u32 %v2488_v15, %v2484_v12  ;;  %v2494_v7 = vrot.slane %v2492_v26, 5 }
 0x154   : > { %v5046_v31 = vadd.f32 %v3596_v18, %v1124_v48  ;;  %v1116_v57 = vadd.f32 %v1115_v49, %v4845_v52  ;;  %v1525_v10 = vpop.f32.mrf.mxu0  ;;  %v2709_v52 = vrot.slane %v2707_v42, 4  ;;  %v2480_v34 = vrot.slane %v2479_v14, 4  ;;  %v5694_v48 = vld [vmem:[#allocation19_spill] sm:$0xff]  ;;  %v5695_v49 = vld [vmem:[#allocation21_spill] sm:$0xff]  ;;  %v5696_v14 = vld [vmem:[#allocation24_spill] sm:$0xff] }
 0x155   : > { %v3565_v13 = vpop.f32.mrf.mxu1  ;;  %3768 = vmatmul.mubr.msk.bf16.gmra.mxu1 %vm670_vm2, %v5681_v46 }
 0x156   : > { %v5051_v56 = vadd.f32 %v1512_v60, %v1116_v57  ;;  %v1137_v32 = vadd.f32 %v3565_v13, %v4855_v45  ;;  %v3600_v54 = vpop.f32.mrf.mxu0  ;;  %3771 = vmatprep.mubr.msk.bf16.mxu1 %vm670_vm2, %v4392_v9  ;;  %v2490_v9 = vrot.slane %v2489_v55, 4  ;;  %v2711_v20 = vsel %vm4397_vm6, %v2709_v52, %v2710_v1  ;;  %v5691_v60 = vld [vmem:[#allocation28_spill] sm:$0xff] }
 0x157   : > { %v1128_v33 = vpop.f32.mrf.mxu1  ;;  %v2485_v36 = vsel %vm4076_vm3, %v2480_v34, %v2484_v12 }
 0x158   : > { %v5057_v25 = vadd.f32 %v3599_v27, %v1137_v32  ;;  %v1129_v46 = vadd.f32 %v1128_v33, %v4861_v28  ;;  %v1528_v11 = vpop.f32.mrf.mxu0  ;;  %v2708_v28 = vsel %vm4397_vm6, %v3326_v63, %v2707_v42  ;;  %v2495_v58 = vsel %vm4076_vm3, %v2490_v9, %v2494_v7  ;;  %v5697_v63 = vld [vmem:[#allocation26_spill] sm:$0xff] }
 0x159   : > { %v3566_v61 = vpop.f32.mrf.mxu1  ;;  %v3308_v12 = vcombine.low %v2485_v36, %v2495_v58  ;;  %v5699_v9 = vld [vmem:[#allocation6_spill] sm:$0xff]  ;;  %v5701_v36 = vld [vmem:[#allocation9_spill] sm:$0xff] }
 0x15a   : > { %v5060_v35 = vadd.f32 %v1525_v10, %v1129_v46  ;;  %v1140_v45 = vadd.f32 %v3566_v61, %v4871_v19  ;;  %v3603_v38 = vpop.f32.mrf.mxu0  ;;  %3806 = vmatmul.mubr.msk.bf16.gmra.mxu0 %vm670_vm2, %v4639_v24 }
 0x15b   : > { %v1131_v23 = vpop.f32.mrf.mxu1  ;;  %3809 = vmatprep.mubr.msk.bf16.mxu0 %vm670_vm2, %v4718_v8  ;;  %v5693_v8 = vld [vmem:[#allocation23_spill] sm:$0xff] }
 0x15c   : > { %v5071_v18 = vadd.f32 %v3600_v54, %v1140_v45  ;;  %v1132_v19 = vadd.f32 %v1131_v23, %v4877_v0  ;;  %v1541_v37 = vpop.f32.mrf.mxu0  ;;  %v3329_v0 = vcombine.low %v2708_v28, %v2711_v20 }
 0x15d   : > { %v3569_v5 = vpop.f32.mrf.mxu1  ;;  %3772 = vmatmul.mubr.msk.bf16.gmra.mxu1 %vm670_vm2, %v5691_v60 }
 0x15e   : > { %v5078_v51 = vadd.f32 %v1528_v11, %v1132_v19  ;;  %v1153_v47 = vadd.f32 %v3569_v5, %v5693_v8  ;;  %v3604_v15 = vpop.f32.mrf.mxu0  ;;  %3775 = vmatprep.mubr.msk.bf16.mxu1 %vm670_vm2, %v5694_v48  ;;  %v5698_v11 = vld [vmem:[#allocation11_spill] sm:$0xff] }
 0x15f   : > { %v1144_v27 = vpop.f32.mrf.mxu1  ;;  %v5700_v19 = vld [vmem:[#allocation7_spill] sm:$0xff] }
 0x160   : > { %v5085_v42 = vadd.f32 %v3603_v38, %v1153_v47  ;;  %v1145_v2 = vadd.f32 %v1144_v27, %v5695_v49  ;;  %v1544_v57 = vpop.f32.mrf.mxu0 }
 0x161   : > { %v3570_v10 = vpop.f32.mrf.mxu1 }
 0x162   : > { %v5088_v13 = vadd.f32 %v1541_v37, %v1145_v2  ;;  %v1156_v32 = vadd.f32 %v3570_v10, %v5696_v14  ;;  %v3607_v54 = vpop.f32.mrf.mxu0  ;;  %3810 = vmatmul.mubr.msk.bf16.gmra.mxu0 %vm670_vm2, %v3329_v0 }
 0x163   : > { %v1147_v55 = vpop.f32.mrf.mxu1 }
 0x164   : > { %v5092_v26 = vadd.f32 %v3604_v15, %v1156_v32  ;;  %v1148_v33 = vadd.f32 %v1147_v55, %v5697_v63  ;;  %v1557_v52 = vpop.f32.mrf.mxu0 }
 0x165   : > { %v3573_v1 = vpop.f32.mrf.mxu1  ;;  %3776 = vmatmul.mubr.msk.bf16.gmra.mxu1 %vm670_vm2, %v3308_v12 }
 0x166   : > { %v5096_v46 = vadd.f32 %v1544_v57, %v1148_v33  ;;  %v1169_v61 = vadd.f32 %v3573_v1, %v5698_v11  ;;  %v3608_v34 = vpop.f32.mrf.mxu0 }
 0x167   : > { %v1160_v45 = vpop.f32.mrf.mxu1 }
 0x168   : > { %v5099_v38 = vadd.f32 %v3607_v54, %v1169_v61  ;;  %v1161_v7 = vadd.f32 %v1160_v45, %v5699_v9  ;;  %v1560_v23 = vpop.f32.mrf.mxu0 }
 0x169   : > { %v3574_v28 = vpop.f32.mrf.mxu1 }
 0x16a   : > { %v5102_v20 = vadd.f32 %v1557_v52, %v1161_v7  ;;  %v1172_v37 = vadd.f32 %v3574_v28, %v5700_v19  ;;  %v3647_v5 = vpop.f32.mrf.mxu0 }
 0x16b   : > { %v1163_v60 = vpop.f32.mrf.mxu1 }
 0x16c   : > { %v5105_v24 = vadd.f32 %v3608_v34, %v1172_v37  ;;  %v1164_v8 = vadd.f32 %v1163_v60, %v5701_v36  ;;  %v1887_v47 = vpop.f32.mrf.mxu0 }
 0x16d   : > { %v3613_v15 = vpop.f32.mrf.mxu1 }
 0x16e   : > { %v5108_v48 = vadd.f32 %v1560_v23, %v1164_v8  ;;  %v1784_v58 = vadd.f32 %v3613_v15, %v4950_v41  ;;  %v3648_v0 = vpop.f32.mrf.mxu0 }
 0x16f   : > { %v1655_v27 = vpop.f32.mrf.mxu1 }
 0x170   : > { %v5111_v49 = vadd.f32 %v3647_v5, %v1784_v58  ;;  %v1782_v2 = vadd.f32 %v1655_v27, %v4953_v29  ;;  %v1890_v57 = vpop.f32.mrf.mxu0 }
 0x171   : > { %v3614_v10 = vpop.f32.mrf.mxu1 }
 0x172   : > { %v5114_v12 = vadd.f32 %v1887_v47, %v1782_v2  ;;  %v1785_v14 = vadd.f32 %v3614_v10, %v4960_v44  ;;  %v3651_v32 = vpop.f32.mrf.mxu0 }
 0x173   : > { %v1658_v54 = vpop.f32.mrf.mxu1 }
 0x174   : > { %v5117_v55 = vadd.f32 %v3648_v0, %v1785_v14  ;;  %v1783_v63 = vadd.f32 %v1658_v54, %v4965_v3  ;;  %v1903_v33 = vpop.f32.mrf.mxu0 }
 0x175   : > { %v3617_v41 = vpop.f32.mrf.mxu1 }
 0x176   : > { %v5120_v52 = vadd.f32 %v1890_v57, %v1783_v63  ;;  %v1788_v1 = vadd.f32 %v3617_v41, %v4970_v21  ;;  %v3652_v11 = vpop.f32.mrf.mxu0 }
 0x177   : > { %v1671_v29 = vpop.f32.mrf.mxu1 }
 0x178   : > { %v5123_v61 = vadd.f32 %v3651_v32, %v1788_v1  ;;  %v1786_v34 = vadd.f32 %v1671_v29, %v4973_v6  ;;  %v1906_v45 = vpop.f32.mrf.mxu0 }
 0x179   : > { %v3618_v44 = vpop.f32.mrf.mxu1 }
 0x17a   : > { %v5126_v9 = vadd.f32 %v1903_v33, %v1786_v34  ;;  %v1789_v7 = vadd.f32 %v3618_v44, %v4980_v39  ;;  %v3655_v23 = vpop.f32.mrf.mxu0 }
 0x17b   : > { %v1674_v3 = vpop.f32.mrf.mxu1 }
 0x17c   : > { %v5129_v28 = vadd.f32 %v3652_v11, %v1789_v7  ;;  %v1787_v19 = vadd.f32 %v1674_v3, %v4985_v40  ;;  %v1919_v37 = vpop.f32.mrf.mxu0 }
 0x17d   : > { %v3621_v21 = vpop.f32.mrf.mxu1 }
 0x17e   : > { %v5132_v5 = vadd.f32 %v1906_v45, %v1787_v19  ;;  %v1792_v60 = vadd.f32 %v3621_v21, %v4990_v50  ;;  %v3656_v36 = vpop.f32.mrf.mxu0 }
 0x17f   : > { %v1687_v6 = vpop.f32.mrf.mxu1 }
 0x180   : > { %v5135_v8 = vadd.f32 %v3655_v23, %v1792_v60  ;;  %v1790_v47 = vadd.f32 %v1687_v6, %v4993_v59  ;;  %v1922_v15 = vpop.f32.mrf.mxu0 }
 0x181   : > { %v3622_v39 = vpop.f32.mrf.mxu1 }
 0x182   : > { %v5138_v58 = vadd.f32 %v1919_v37, %v1790_v47  ;;  %v1793_v0 = vadd.f32 %v3622_v39, %v5000_v16  ;;  %v3659_v27 = vpop.f32.mrf.mxu0 }
 0x183   : > { %v1690_v40 = vpop.f32.mrf.mxu1 }
 0x184   : > { %v5141_v2 = vadd.f32 %v3656_v36, %v1793_v0  ;;  %v1791_v57 = vadd.f32 %v1690_v40, %v5005_v53  ;;  %v1935_v10 = vpop.f32.mrf.mxu0 }
 0x185   : > { %v3625_v50 = vpop.f32.mrf.mxu1 }
 0x186   : > { %v5144_v14 = vadd.f32 %v1922_v15, %v1791_v57  ;;  %v1796_v32 = vadd.f32 %v3625_v50, %v5010_v22  ;;  %v3660_v54 = vpop.f32.mrf.mxu0 }
 0x187   : > { %v1703_v59 = vpop.f32.mrf.mxu1 }
 0x188   : > { %v5147_v63 = vadd.f32 %v3659_v27, %v1796_v32  ;;  %v1794_v33 = vadd.f32 %v1703_v59, %v5013_v30  ;;  %v1938_v41 = vpop.f32.mrf.mxu0 }
 0x189   : > { %v3626_v16 = vpop.f32.mrf.mxu1 }
 0x18a   : > { %v5150_v1 = vadd.f32 %v1935_v10, %v1794_v33  ;;  %v1797_v11 = vadd.f32 %v3626_v16, %v5020_v17  ;;  %v3663_v29 = vpop.f32.mrf.mxu0 }
 0x18b   : > { %v1706_v53 = vpop.f32.mrf.mxu1 }
 0x18c   : > { %v5153_v34 = vadd.f32 %v3660_v54, %v1797_v11  ;;  %v1795_v45 = vadd.f32 %v1706_v53, %v5029_v4  ;;  %v1951_v44 = vpop.f32.mrf.mxu0 }
 0x18d   : > { %v3629_v22 = vpop.f32.mrf.mxu1 }
 0x18e   : > { %v5156_v7 = vadd.f32 %v1938_v41, %v1795_v45  ;;  %v1800_v23 = vadd.f32 %v3629_v22, %v5034_v43  ;;  %v3664_v3 = vpop.f32.mrf.mxu0 }
 0x18f   : > { %v1719_v30 = vpop.f32.mrf.mxu1 }
 0x190   : > { %v5159_v19 = vadd.f32 %v3663_v29, %v1800_v23  ;;  %v1798_v37 = vadd.f32 %v1719_v30, %v5037_v62  ;;  %v1954_v21 = vpop.f32.mrf.mxu0 }
 0x191   : > { %v3630_v17 = vpop.f32.mrf.mxu1 }
 0x192   : > { %v5162_v60 = vadd.f32 %v1951_v44, %v1798_v37  ;;  %v1801_v36 = vadd.f32 %v3630_v17, %v5046_v31  ;;  %v3667_v6 = vpop.f32.mrf.mxu0 }
 0x193   : > { %v1722_v4 = vpop.f32.mrf.mxu1 }
 0x194   : > { %v5165_v47 = vadd.f32 %v3664_v3, %v1801_v36  ;;  %v1799_v15 = vadd.f32 %v1722_v4, %v5051_v56  ;;  %v1967_v39 = vpop.f32.mrf.mxu0 }
 0x195   : > { %v3633_v43 = vpop.f32.mrf.mxu1 }
 0x196   : > { %5702 = vst [vmem:[#allocation12_spill] sm:$0xff] %v5165_v47  ;;  %v5168_v0 = vadd.f32 %v1954_v21, %v1799_v15  ;;  %v1804_v27 = vadd.f32 %v3633_v43, %v5057_v25  ;;  %v3668_v40 = vpop.f32.mrf.mxu0 }
 0x197   : > { %v1735_v62 = vpop.f32.mrf.mxu1 }
 0x198   : > { %5703 = vst [vmem:[#allocation10_spill] sm:$0xff] %v5168_v0  ;;  %v5171_v57 = vadd.f32 %v3667_v6, %v1804_v27  ;;  %v1802_v10 = vadd.f32 %v1735_v62, %v5060_v35  ;;  %v1970_v50 = vpop.f32.mrf.mxu0 }
 0x199   : > { %v3634_v31 = vpop.f32.mrf.mxu1 }
 0x19a   : > { %5704 = vst [vmem:[#allocation14_spill] sm:$0xff] %v5171_v57  ;;  %v5174_v32 = vadd.f32 %v1967_v39, %v1802_v10  ;;  %v1805_v54 = vadd.f32 %v3634_v31, %v5071_v18  ;;  %v3671_v59 = vpop.f32.mrf.mxu0 }
 0x19b   : > { %v1738_v56 = vpop.f32.mrf.mxu1 }
 0x19c   : > { %5705 = vst [vmem:[#allocation16_spill] sm:$0xff] %v5174_v32  ;;  %v5177_v33 = vadd.f32 %v3668_v40, %v1805_v54  ;;  %v1803_v41 = vadd.f32 %v1738_v56, %v5078_v51  ;;  %v1983_v16 = vpop.f32.mrf.mxu0 }
 0x19d   : > { %v3637_v25 = vpop.f32.mrf.mxu1 }
 0x19e   : > { %5706 = vst [vmem:[#allocation18_spill] sm:$0xff] %v5177_v33  ;;  %v5180_v11 = vadd.f32 %v1970_v50, %v1803_v41  ;;  %v1808_v29 = vadd.f32 %v3637_v25, %v5085_v42  ;;  %v3672_v53 = vpop.f32.mrf.mxu0 }
 0x19f   : > { %v1751_v35 = vpop.f32.mrf.mxu1 }
 0x1a0   : > { %5707 = vst [vmem:[#allocation22_spill] sm:$0xff] %v5180_v11  ;;  %v5183_v45 = vadd.f32 %v3671_v59, %v1808_v29  ;;  %v1806_v44 = vadd.f32 %v1751_v35, %v5088_v13  ;;  %v1986_v22 = vpop.f32.mrf.mxu0 }
 0x1a1   : > { %v3638_v18 = vpop.f32.mrf.mxu1 }
 0x1a2   : > { %5708 = vst [vmem:[#allocation27_spill] sm:$0xff] %v5183_v45  ;;  %v5186_v23 = vadd.f32 %v1983_v16, %v1806_v44  ;;  %v1809_v3 = vadd.f32 %v3638_v18, %v5092_v26  ;;  %v3675_v30 = vpop.f32.mrf.mxu0 }
 0x1a3   : > { %v1754_v51 = vpop.f32.mrf.mxu1 }
 0x1a4   : > { %5709 = vst [vmem:[#allocation8_spill] sm:$0xff] %v5186_v23  ;;  %v5189_v37 = vadd.f32 %v3672_v53, %v1809_v3  ;;  %v1807_v21 = vadd.f32 %v1754_v51, %v5096_v46  ;;  %v1999_v17 = vpop.f32.mrf.mxu0 }
 0x1a5   : > { %v3641_v42 = vpop.f32.mrf.mxu1 }
 0x1a6   : > { %5710 = vst [vmem:[#allocation13_spill] sm:$0xff] %v5189_v37  ;;  %v5192_v36 = vadd.f32 %v1986_v22, %v1807_v21  ;;  %v1812_v6 = vadd.f32 %v3641_v42, %v5099_v38  ;;  %v3676_v4 = vpop.f32.mrf.mxu0 }
 0x1a7   : > { %v1767_v13 = vpop.f32.mrf.mxu1 }
 0x1a8   : > { %5711 = vst [vmem:[#allocation15_spill] sm:$0xff] %v5192_v36  ;;  %v5195_v15 = vadd.f32 %v3675_v30, %v1812_v6  ;;  %v1810_v39 = vadd.f32 %v1767_v13, %v5102_v20  ;;  %v2002_v43 = vpop.f32.mrf.mxu0 }
 0x1a9   : > { %v3642_v26 = vpop.f32.mrf.mxu1 }
 0x1aa   : > { %5712 = vst [vmem:[#allocation17_spill] sm:$0xff] %v5195_v15  ;;  %v5198_v27 = vadd.f32 %v1999_v17, %v1810_v39  ;;  %v1813_v40 = vadd.f32 %v3642_v26, %v5105_v24  ;;  %v5201_v62 = vpop.f32.mrf.mxu0 }
 0x1ab   : > { %v1770_v46 = vpop.f32.mrf.mxu1 }
 0x1ac   : > { %5713 = vst [vmem:[#allocation20_spill] sm:$0xff] %v5198_v27  ;;  %v5203_v10 = vadd.f32 %v3676_v4, %v1813_v40  ;;  %v1811_v50 = vadd.f32 %v1770_v46, %v5108_v48  ;;  %v5206_v38 = vpop.f32.mrf.mxu0 }
 0x1ad   : > { %v3681_v31 = vpop.f32.mrf.mxu1 }
 0x1ae   : > { %5714 = vst [vmem:[#allocation25_spill] sm:$0xff] %v5203_v10  ;;  %v5208_v54 = vadd.f32 %v2002_v43, %v1811_v50  ;;  %v5210_v59 = vpop.f32.mrf.mxu0 }
 0x1af   : > { %v2103_v20 = vpop.f32.mrf.mxu1 }
 0x1b0   : > { %5715 = vst [vmem:[#allocation28_spill] sm:$0xff] %v5208_v54  ;;  %v5212_v56 = vpop.f32.mrf.mxu0 }
 0x1b1   : > { %v3682_v41 = vpop.f32.mrf.mxu1 }
 0x1b2   : > { %v5214_v16 = vpop.f32.mrf.mxu0 }
 0x1b3   : > { %v5216_v24 = vpop.f32.mrf.mxu1 }
 0x1b4   : > { %v5218_v25 = vpop.f32.mrf.mxu0 }
 0x1b5   : > { %v5220_v29 = vpop.f32.mrf.mxu1 }
 0x1b6   : > { %v5222_v48 = vpop.f32.mrf.mxu0 }
 0x1b7   : > { %v5224_v53 = vpop.f32.mrf.mxu1 }
 0x1b8   : > { %v5226_v35 = vpop.f32.mrf.mxu0 }
 0x1b9   : > { %v5228_v44 = vpop.f32.mrf.mxu1 }
 0x1ba   : > { %v5230_v22 = vpop.f32.mrf.mxu0 }
 0x1bb   : > { %v5232_v18 = vpop.f32.mrf.mxu1 }
 0x1bc   : > { %v5234_v3 = vpop.f32.mrf.mxu0 }
 0x1bd   : > { %v5236_v30 = vpop.f32.mrf.mxu1 }
 0x1be   : > { %v5238_v51 = vpop.f32.mrf.mxu0 }
 0x1bf   : > { %v5240_v21 = vpop.f32.mrf.mxu1 }
 0x1c0   : > { %v5242_v17 = vpop.f32.mrf.mxu0 }
 0x1c1   : > { %v5244_v42 = vpop.f32.mrf.mxu1 }
 0x1c2   : > { %v5246_v6 = vpop.f32.mrf.mxu0 }
 0x1c3   : > { %v5248_v4 = vpop.f32.mrf.mxu1 }
 0x1c4   : > { %v5250_v13 = vpop.f32.mrf.mxu0 }
 0x1c5   : > { %v5252_v39 = vpop.f32.mrf.mxu1 }
 0x1c6   : > { %v5254_v43 = vpop.f32.mrf.mxu0 }
 0x1c7   : > { %v5256_v26 = vpop.f32.mrf.mxu1 }
 0x1c8   : > { %v5258_v40 = vpop.f32.mrf.mxu0 }
 0x1c9   : > { %v5260_v46 = vpop.f32.mrf.mxu1 }
 0x1ca   : > { %v5262_v50 = vpop.f32.mrf.mxu0 }
 0x1cb   : > { %v5264_v54 = vpop.f32.mrf.mxu1 }
 0x1cc   : > { %v5266_v10 = vpop.f32.mrf.mxu0 }
 0x1cd   : > { %5716 = vst [vmem:[#allocation5_spill] sm:$0xff] %v5266_v10  ;;  %v5268_v27 = vpop.f32.mrf.mxu1 }
 0x1ce   : > { %v5270_v15 = vpop.f32.mrf.mxu0 }
 0x1cf   : > { %5717 = vst [vmem:[#allocation23_spill] sm:$0xff] %v5270_v15  ;;  %v5272_v36 = vpop.f32.mrf.mxu1 }
 0x1d0   : > { %v5274_v37 = vpop.f32.mrf.mxu0 }
 0x1d1   : > { %5718 = vst [vmem:[#allocation19_spill] sm:$0xff] %v5274_v37  ;;  %v5276_v23 = vpop.f32.mrf.mxu1 }
 0x1d2   : > { %5719 = vst [vmem:[#allocation21_spill] sm:$0xff] %v5276_v23  ;;  %v5278_v45 = vpop.f32.mrf.mxu0 }
 0x1d3   : > { %5720 = vst [vmem:[#allocation24_spill] sm:$0xff] %v5278_v45  ;;  %v5280_v11 = vpop.f32.mrf.mxu1 }
 0x1d4   : > { %5721 = vst [vmem:[#allocation26_spill] sm:$0xff] %v5280_v11  ;;  %v5282_v33 = vpop.f32.mrf.mxu0 }
 0x1d5   : > { %5722 = vst [vmem:[#allocation11_spill] sm:$0xff] %v5282_v33  ;;  %v5284_v32 = vpop.f32.mrf.mxu1 }
 0x1d6   : > { %5723 = vst [vmem:[#allocation6_spill] sm:$0xff] %v5284_v32  ;;  %v5286_v57 = vpop.f32.mrf.mxu0 }
 0x1d7   : > { %5724 = vst [vmem:[#allocation7_spill] sm:$0xff] %v5286_v57  ;;  %v5288_v0 = vpop.f32.mrf.mxu1 }
 0x1d8   : > { %5725 = vst [vmem:[#allocation9_spill] sm:$0xff] %v5288_v0  ;;  %v5290_v10 = vpop.f32.mrf.mxu0 }
 0x1d9   : > { %5726 = vst [vmem:[#allocation29_spill] sm:$0xff] %v5290_v10  ;;  %v5292_v15 = vpop.f32.mrf.mxu1 }
 0x1da   : > { %5727 = vst [vmem:[#allocation30_spill] sm:$0xff] %v5292_v15  ;;  %v5294_v47 = vpop.f32.mrf.mxu0 }
 0x1db   : > { %5728 = vst [vmem:[#allocation31_spill] sm:$0xff] %v5294_v47  ;;  %v5296_v37 = vpop.f32.mrf.mxu1 }
 0x1dc   : > { %5729 = vst [vmem:[#allocation32_spill] sm:$0xff] %v5296_v37  ;;  %v5298_v23 = vpop.f32.mrf.mxu0 }
 0x1dd   : > { %5730 = vst [vmem:[#allocation33_spill] sm:$0xff] %v5298_v23  ;;  %v5300_v45 = vpop.f32.mrf.mxu1 }
 0x1de   : > { %5731 = vst [vmem:[#allocation34_spill] sm:$0xff] %v5300_v45  ;;  %v5302_v11 = vpop.f32.mrf.mxu0 }
 0x1df   : > { %5732 = vst [vmem:[#allocation35_spill] sm:$0xff] %v5302_v11  ;;  %v5304_v33 = vpop.f32.mrf.mxu1  ;;  %v2232_v11 = vadd.f32 %v3681_v31, %v5111_v49  ;;  %v2231_v49 = vadd.f32 %v5216_v24, %v5120_v52  ;;  %v2234_v52 = vadd.f32 %v5224_v53, %v5126_v9 }
 0x1e0   : > { %5733 = vst [vmem:[#allocation36_spill] sm:$0xff] %v5304_v33  ;;  %v5306_v32 = vpop.f32.mrf.mxu0 }
 0x1e1   : > { %5734 = vst [vmem:[#allocation37_spill] sm:$0xff] %v5306_v32  ;;  %v5308_v57 = vpop.f32.mrf.mxu1 }
 0x1e2   : > { %5735 = vst [vmem:[#allocation38_spill] sm:$0xff] %v5308_v57  ;;  %v5310_v0 = vpop.f32.mrf.mxu0  ;;  %v2230_v57 = vadd.f32 %v2103_v20, %v5114_v12  ;;  %v2236_v12 = vadd.f32 %v5220_v29, %v5123_v61  ;;  %v5341_v20 = vld [vmem:[%s5580_s2] ss:$0 sm:$0xff] }
 0x1e3   : > { %5736 = vst [vmem:[#allocation39_spill] sm:$0xff] %v5310_v0  ;;  %v5312_v10 = vpop.f32.mrf.mxu1 }
 0x1e4   : > { %5737 = vst [vmem:[#allocation40_spill] sm:$0xff] %v5312_v10  ;;  %v5314_v47 = vpop.f32.mrf.mxu0 }
 0x1e5   : > { %5738 = vst [vmem:[#allocation41_spill] sm:$0xff] %v5314_v47  ;;  %v5316_v37 = vpop.f32.mrf.mxu1  ;;  %v2442_v47 = vadd.f32 %v5201_v62, %v2232_v11 }
 0x1e6   : > { %5739 = vst [vmem:[#allocation42_spill] sm:$0xff] %v5316_v37  ;;  %v5318_v23 = vpop.f32.mrf.mxu0  ;;  %v2233_v37 = vadd.f32 %v3682_v41, %v5117_v55 }
 0x1e7   : > { %5740 = vst [vmem:[#allocation43_spill] sm:$0xff] %v5318_v23  ;;  %v5320_v45 = vpop.f32.mrf.mxu1 }
 0x1e8   : > { %5741 = vst [vmem:[#allocation44_spill] sm:$0xff] %v5320_v45  ;;  %v5323_v33 = vpop.f32.mrf.mxu0  ;;  %v2440_v45 = vadd.f32 %v5206_v38, %v2230_v57  ;;  %v2443_v55 = vadd.f32 %v5210_v59, %v2233_v37  ;;  %v2237_v37 = vadd.f32 %v5228_v44, %v5129_v28 }
 0x1e9   : > { %5742 = vst [vmem:[#allocation45_spill] sm:$0xff] %v5323_v33  ;;  %v5325_v32 = vpop.f32.mrf.mxu1 }
 0x1ea   : > { %v3783_v0 = vpop.f32.mrf.mxu0 }
 0x1eb   : > { %v5328_v15 = vpop.f32.mrf.mxu1 }
 0x1ec   : > { %5743 = vst [vmem:[#allocation46_spill] sm:$0xff] %v5328_v15  ;;  %v2761_v10 = vpop.f32.mrf.mxu0  ;;  %v2446_v15 = vadd.f32 %v5214_v16, %v2236_v12 }
 0x1ed   : > { %v3749_v23 = vpop.f32.mrf.mxu1 }
 0x1ee   : > { %v2674_v31 = vadd.f32 %v3749_v23, %v2442_v47  ;;  %v3784_v33 = vpop.f32.mrf.mxu0  ;;  %v2441_v23 = vadd.f32 %v5212_v56, %v2231_v49  ;;  %v2444_v56 = vadd.f32 %v5218_v25, %v2234_v52  ;;  %v2240_v25 = vadd.f32 %v5236_v30, %v5135_v8 }
 0x1ef   : > { %v2545_v11 = vpop.f32.mrf.mxu1 }
 0x1f0   : > { %v2890_v62 = vadd.f32 %v3783_v0, %v2674_v31  ;;  %v2672_v57 = vadd.f32 %v2545_v11, %v2440_v45  ;;  %v2764_v38 = vpop.f32.mrf.mxu0  ;;  %v2447_v11 = vadd.f32 %v5222_v48, %v2237_v37 }
 0x1f1   : > { %v3750_v47 = vpop.f32.mrf.mxu1 }
 0x1f2   : > { %v2929_v61 = vadd.f32 %v5341_v20, %v2890_v62  ;;  %v2888_v41 = vadd.f32 %v2761_v10, %v2672_v57  ;;  %v2675_v24 = vadd.f32 %v3750_v47, %v2443_v55  ;;  %v3787_v29 = vpop.f32.mrf.mxu0  ;;  %v2235_v10 = vadd.f32 %v5232_v18, %v5132_v5 }
 0x1f3   : > { %v2548_v0 = vpop.f32.mrf.mxu1 }
 0x1f4   : > { %v2961_v45 = vmax.f32 %v2929_v61, 0.0  ;;  %v2927_v59 = vadd.f32 %v5341_v20, %v2888_v41  ;;  %v2891_v31 = vadd.f32 %v3784_v33, %v2675_v24  ;;  %v2673_v9 = vadd.f32 %v2548_v0, %v2441_v23  ;;  %v2777_v53 = vpop.f32.mrf.mxu0 }
 0x1f5   : > { %v3753_v49 = vpop.f32.mrf.mxu1  ;;  %v2445_v47 = vadd.f32 %v5226_v35, %v2235_v10  ;;  %v2450_v41 = vadd.f32 %v5230_v22, %v2240_v25  ;;  %v2241_v24 = vadd.f32 %v5244_v42, %v5141_v2  ;;  %v2244_v10 = vadd.f32 %v5252_v39, %v5147_v63 }
 0x1f6   : > { %2994 = vst.msk [vmem:[%s5357_s6 + $0x10] sm:$0xff] %vm2991_vm7, %v2961_v45  ;;  %v2959_v28 = vmax.f32 %v2927_v59, 0.0  ;;  %v2930_v16 = vadd.f32 %v5341_v20, %v2891_v31  ;;  %v2889_v44 = vadd.f32 %v2764_v38, %v2673_v9  ;;  %v2678_v33 = vadd.f32 %v3753_v49, %v2446_v15  ;;  %v3788_v12 = vpop.f32.mrf.mxu0 }
 0x1f7   : > { %v2561_v5 = vpop.f32.mrf.mxu1  ;;  %v2238_v15 = vadd.f32 %v5240_v21, %v5138_v58  ;;  %v2239_v59 = vadd.f32 %v5248_v4, %v5144_v14 }
 0x1f8   : > { %2992 = vst.msk [vmem:[%s5357_s6] sm:$0xff] %vm2991_vm7, %v2959_v28  ;;  %v2962_v18 = vmax.f32 %v2930_v16, 0.0  ;;  %v2928_v55 = vadd.f32 %v5341_v20, %v2889_v44  ;;  %v2894_v62 = vadd.f32 %v3787_v29, %v2678_v33  ;;  %v2676_v57 = vadd.f32 %v2561_v5, %v2444_v56  ;;  %v2780_v52 = vpop.f32.mrf.mxu0 }
 0x1f9   : > { %v3754_v38 = vpop.f32.mrf.mxu1  ;;  %v2448_v45 = vadd.f32 %v5234_v3, %v2238_v15  ;;  %v2451_v56 = vadd.f32 %v5238_v51, %v2241_v24  ;;  %v2449_v44 = vadd.f32 %v5242_v17, %v2239_v59  ;;  %v2242_v33 = vadd.f32 %v5256_v26, %v5150_v1 }
 0x1fa   : > { %2995 = vst.msk [vmem:[%s5357_s6 + $0x18] sm:$0xff] %vm2991_vm7, %v2962_v18  ;;  %v2960_v48 = vmax.f32 %v2928_v55, 0.0  ;;  %v2933_v8 = vadd.f32 %v5341_v20, %v2894_v62  ;;  %v2892_v30 = vadd.f32 %v2777_v53, %v2676_v57  ;;  %v2679_v23 = vadd.f32 %v3754_v38, %v2447_v11  ;;  %v3791_v61 = vpop.f32.mrf.mxu0 }
 0x1fb   : > { %v2564_v29 = vpop.f32.mrf.mxu1  ;;  %v2454_v5 = vadd.f32 %v5246_v6, %v2244_v10  ;;  %v2245_v18 = vadd.f32 %v5260_v46, %v5153_v34 }
 0x1fc   : > { %2993 = vst.msk [vmem:[%s5357_s6 + $0x8] sm:$0xff] %vm2991_vm7, %v2960_v48  ;;  %v2965_v35 = vmax.f32 %v2933_v8, 0.0  ;;  %v2931_v58 = vadd.f32 %v5341_v20, %v2892_v30  ;;  %v2895_v21 = vadd.f32 %v3788_v12, %v2679_v23  ;;  %v2677_v37 = vadd.f32 %v2564_v29, %v2445_v47  ;;  %v2793_v0 = vpop.f32.mrf.mxu0 }
 0x1fd   : > { %v3757_v31 = vpop.f32.mrf.mxu1  ;;  %v2243_v47 = vadd.f32 %v5264_v54, %v5156_v7  ;;  %v2455_v8 = vadd.f32 %v5254_v43, %v2245_v18  ;;  %v2248_v30 = vadd.f32 %v5268_v27, %v5159_v19  ;;  %v2246_v29 = vadd.f32 %v5272_v36, %v5162_v60 }
 0x1fe   : > { %2998 = vst.msk [vmem:[%s5357_s6 + $0x30] sm:$0xff] %vm2991_vm7, %v2965_v35  ;;  %v2963_v22 = vmax.f32 %v2931_v58, 0.0  ;;  %v2934_v2 = vadd.f32 %v5341_v20, %v2895_v21  ;;  %v2893_v42 = vadd.f32 %v2780_v52, %v2677_v37  ;;  %v2682_v9 = vadd.f32 %v3757_v31, %v2450_v41  ;;  %v3792_v53 = vpop.f32.mrf.mxu0 }
 0x1ff   : > { %v2577_v49 = vpop.f32.mrf.mxu1  ;;  %v2452_v52 = vadd.f32 %v5250_v13, %v2242_v33  ;;  %v2453_v24 = vadd.f32 %v5258_v40, %v2243_v47  ;;  %v2458_v37 = vadd.f32 %v5262_v50, %v2248_v30  ;;  %v5750_v33 = vld [vmem:[#allocation14_spill] sm:$0xff] }
 0x200   : > { %2996 = vst.msk [vmem:[%s5357_s6 + $0x20] sm:$0xff] %vm2991_vm7, %v2963_v22  ;;  %v2966_v3 = vmax.f32 %v2934_v2, 0.0  ;;  %v2932_v14 = vadd.f32 %v5341_v20, %v2893_v42  ;;  %v2898_v4 = vadd.f32 %v3791_v61, %v2682_v9  ;;  %v2680_v28 = vadd.f32 %v2577_v49, %v2448_v45  ;;  %v2796_v16 = vpop.f32.mrf.mxu0  ;;  %v5745_v45 = vld [vmem:[#allocation21_spill] sm:$0xff] }
 0x201   : > { %v3758_v12 = vpop.f32.mrf.mxu1  ;;  %v5746_v42 = vld [vmem:[#allocation5_spill] sm:$0xff] }
 0x202   : > { %2999 = vst.msk [vmem:[%s5357_s6 + $0x38] sm:$0xff] %vm2991_vm7, %v2966_v3  ;;  %v2964_v51 = vmax.f32 %v2932_v14, 0.0  ;;  %v2937_v63 = vadd.f32 %v5341_v20, %v2898_v4  ;;  %v2896_v39 = vadd.f32 %v2793_v0, %v2680_v28  ;;  %v2683_v11 = vadd.f32 %v3758_v12, %v2451_v56  ;;  %v3795_v25 = vpop.f32.mrf.mxu0  ;;  %v5744_v0 = vld [vmem:[#allocation12_spill] sm:$0xff]  ;;  %v5748_v56 = vld [vmem:[#allocation26_spill] sm:$0xff] }
 0x203   : > { %v2580_v55 = vpop.f32.mrf.mxu1  ;;  %v2249_v59 = vadd.f32 %v5745_v45, %v5744_v0  ;;  %v2456_v9 = vadd.f32 %v5746_v42, %v2246_v29  ;;  %v5751_v12 = vld [vmem:[#allocation6_spill] sm:$0xff] }
 0x204   : > { %2997 = vst.msk [vmem:[%s5357_s6 + $0x28] sm:$0xff] %vm2991_vm7, %v2964_v51  ;;  %v2969_v17 = vmax.f32 %v2937_v63, 0.0  ;;  %v2935_v1 = vadd.f32 %v5341_v20, %v2896_v39  ;;  %v2899_v26 = vadd.f32 %v3792_v53, %v2683_v11  ;;  %v2681_v62 = vadd.f32 %v2580_v55, %v2449_v44  ;;  %v2809_v57 = vpop.f32.mrf.mxu0  ;;  %v5747_v53 = vld [vmem:[#allocation10_spill] sm:$0xff]  ;;  %v5752_v55 = vld [vmem:[#allocation19_spill] sm:$0xff] }
 0x205   : > { %v3761_v15 = vpop.f32.mrf.mxu1  ;;  %v2247_v10 = vadd.f32 %v5748_v56, %v5747_v53  ;;  %v2252_v51 = vadd.f32 %v5751_v12, %v5750_v33 }
 0x206   : > { %3002 = vst.msk [vmem:[%s5357_s6 + $0x50] sm:$0xff] %vm2991_vm7, %v2969_v17  ;;  %v2967_v6 = vmax.f32 %v2935_v1, 0.0  ;;  %v2938_v34 = vadd.f32 %v5341_v20, %v2899_v26  ;;  %v2897_v46 = vadd.f32 %v2796_v16, %v2681_v62  ;;  %v2686_v38 = vadd.f32 %v3761_v15, %v2454_v5  ;;  %v3796_v48 = vpop.f32.mrf.mxu0  ;;  %v5749_v16 = vld [vmem:[#allocation23_spill] sm:$0xff]  ;;  %v5753_v1 = vld [vmem:[#allocation16_spill] sm:$0xff]  ;;  %v5754_v26 = vld [vmem:[#allocation9_spill] sm:$0xff] }
 0x207   : > { %v2593_v23 = vpop.f32.mrf.mxu1  ;;  %v2459_v44 = vadd.f32 %v5749_v16, %v2249_v59  ;;  %v2457_v17 = vadd.f32 %v5752_v55, %v2247_v10  ;;  %v2250_v62 = vadd.f32 %v5754_v26, %v5753_v1  ;;  %v5761_v59 = vld [vmem:[#allocation7_spill] sm:$0xff]  ;;  %v5764_v10 = vld [vmem:[#allocation29_spill] sm:$0xff] }
 0x208   : > { %3000 = vst.msk [vmem:[%s5357_s6 + $0x40] sm:$0xff] %vm2991_vm7, %v2967_v6  ;;  %v2970_v13 = vmax.f32 %v2938_v34, 0.0  ;;  %v2936_v7 = vadd.f32 %v5341_v20, %v2897_v46  ;;  %v2902_v54 = vadd.f32 %v3795_v25, %v2686_v38  ;;  %v2684_v61 = vadd.f32 %v2593_v23, %v2452_v52  ;;  %v2812_v41 = vpop.f32.mrf.mxu0  ;;  %v5755_v46 = vld [vmem:[#allocation24_spill] sm:$0xff] }
 0x209   : > { %v3762_v35 = vpop.f32.mrf.mxu1  ;;  %v2462_v38 = vadd.f32 %v5755_v46, %v2252_v51  ;;  %v5767_v51 = vld [vmem:[#allocation31_spill] sm:$0xff] }
 0x20a   : > { %3003 = vst.msk [vmem:[%s5357_s6 + $0x58] sm:$0xff] %vm2991_vm7, %v2970_v13  ;;  %v2968_v43 = vmax.f32 %v2936_v7, 0.0  ;;  %v2941_v19 = vadd.f32 %v5341_v20, %v2902_v54  ;;  %v2900_v27 = vadd.f32 %v2809_v57, %v2684_v61  ;;  %v2687_v58 = vadd.f32 %v3762_v35, %v2455_v8  ;;  %v3799_v21 = vpop.f32.mrf.mxu0  ;;  %v5757_v8 = vld [vmem:[#allocation30_spill] sm:$0xff] }
 0x20b   : > { %v2596_v31 = vpop.f32.mrf.mxu1  ;;  %v5759_v35 = vld [vmem:[#allocation22_spill] sm:$0xff] }
 0x20c   : > { %3001 = vst.msk [vmem:[%s5357_s6 + $0x48] sm:$0xff] %vm2991_vm7, %v2968_v43  ;;  %v2973_v40 = vmax.f32 %v2941_v19, 0.0  ;;  %v2939_v60 = vadd.f32 %v5341_v20, %v2900_v27  ;;  %v2903_v36 = vadd.f32 %v3796_v48, %v2687_v58  ;;  %v2685_v22 = vadd.f32 %v2596_v31, %v2453_v24  ;;  %v2825_v2 = vpop.f32.mrf.mxu0  ;;  %v5756_v48 = vld [vmem:[#allocation18_spill] sm:$0xff]  ;;  %v5758_v24 = vld [vmem:[#allocation11_spill] sm:$0xff]  ;;  %v5760_v43 = vld [vmem:[#allocation32_spill] sm:$0xff] }
 0x20d   : > { %v3765_v49 = vpop.f32.mrf.mxu1  ;;  %v2253_v30 = vadd.f32 %v5757_v8, %v5756_v48  ;;  %v2460_v29 = vadd.f32 %v5758_v24, %v2250_v62  ;;  %v2251_v19 = vadd.f32 %v5760_v43, %v5759_v35  ;;  %v5770_v62 = vld [vmem:[#allocation33_spill] sm:$0xff] }
 0x20e   : > { %3006 = vst.msk [vmem:[%s5357_s6 + $0x70] sm:$0xff] %vm2991_vm7, %v2973_v40  ;;  %v2971_v50 = vmax.f32 %v2939_v60, 0.0  ;;  %v2942_v3 = vadd.f32 %v5341_v20, %v2903_v36  ;;  %v2901_v14 = vadd.f32 %v2812_v41, %v2685_v22  ;;  %v2690_v4 = vadd.f32 %v3765_v49, %v2458_v37  ;;  %v3800_v28 = vpop.f32.mrf.mxu0  ;;  %v5762_v40 = vld [vmem:[#allocation27_spill] sm:$0xff]  ;;  %v5763_v60 = vld [vmem:[#allocation34_spill] sm:$0xff] }
 0x20f   : > { %v2609_v63 = vpop.f32.mrf.mxu1  ;;  %v2463_v31 = vadd.f32 %v5761_v59, %v2253_v30  ;;  %v2256_v36 = vadd.f32 %v5763_v60, %v5762_v40  ;;  %v2461_v49 = vadd.f32 %v5764_v10, %v2251_v19  ;;  %v5773_v30 = vld [vmem:[#allocation35_spill] sm:$0xff]  ;;  %v5776_v19 = vld [vmem:[#allocation37_spill] sm:$0xff] }
 0x210   : > { %3004 = vst.msk [vmem:[%s5357_s6 + $0x60] sm:$0xff] %vm2991_vm7, %v2971_v50  ;;  %v2974_v39 = vmax.f32 %v2942_v3, 0.0  ;;  %v2940_v11 = vadd.f32 %v5341_v20, %v2901_v14  ;;  %v2906_v25 = vadd.f32 %v3799_v21, %v2690_v4  ;;  %v2688_v5 = vadd.f32 %v2609_v63, %v2456_v9  ;;  %v2828_v18 = vpop.f32.mrf.mxu0  ;;  %v5765_v50 = vld [vmem:[#allocation8_spill] sm:$0xff] }
 0x211   : > { %v3766_v57 = vpop.f32.mrf.mxu1  ;;  %v5766_v3 = vld [vmem:[#allocation36_spill] sm:$0xff]  ;;  %v2466_v63 = vadd.f32 %v5767_v51, %v2256_v36  ;;  %v5779_v36 = vld [vmem:[#allocation39_spill] sm:$0xff] }
 0x212   : > { %3007 = vst.msk [vmem:[%s5357_s6 + $0x78] sm:$0xff] %vm2991_vm7, %v2974_v39  ;;  %v2972_v52 = vmax.f32 %v2940_v11, 0.0  ;;  %v2945_v47 = vadd.f32 %v5341_v20, %v2906_v25  ;;  %v2904_v15 = vadd.f32 %v2825_v2, %v2688_v5  ;;  %v2691_v6 = vadd.f32 %v3766_v57, %v2459_v44  ;;  %v3803_v34 = vpop.f32.mrf.mxu0  ;;  %v5768_v39 = vld [vmem:[#allocation13_spill] sm:$0xff]  ;;  %v5769_v11 = vld [vmem:[#allocation38_spill] sm:$0xff] }
 0x213   : > { %v2612_v23 = vpop.f32.mrf.mxu1  ;;  %v2254_v14 = vadd.f32 %v5766_v3, %v5765_v50  ;;  %v2257_v25 = vadd.f32 %v5769_v11, %v5768_v39  ;;  %v5781_v50 = vld [vmem:[#allocation41_spill] sm:$0xff] }
 0x214   : > { %3005 = vst.msk [vmem:[%s5357_s6 + $0x68] sm:$0xff] %vm2991_vm7, %v2972_v52  ;;  %v2977_v13 = vmax.f32 %v2945_v47, 0.0  ;;  %v2943_v7 = vadd.f32 %v5341_v20, %v2904_v15  ;;  %v2907_v54 = vadd.f32 %v3800_v28, %v2691_v6  ;;  %v2689_v61 = vadd.f32 %v2612_v23, %v2457_v17  ;;  %v2841_v41 = vpop.f32.mrf.mxu0  ;;  %v5771_v52 = vld [vmem:[#allocation15_spill] sm:$0xff]  ;;  %v5772_v47 = vld [vmem:[#allocation40_spill] sm:$0xff] }
 0x215   : > { %v3769_v27 = vpop.f32.mrf.mxu1  ;;  %v2464_v57 = vadd.f32 %v5770_v62, %v2254_v14  ;;  %v2255_v15 = vadd.f32 %v5772_v47, %v5771_v52  ;;  %v2467_v23 = vadd.f32 %v5773_v30, %v2257_v25  ;;  %v5782_v14 = vld [vmem:[#allocation28_spill] sm:$0xff] }
 0x216   : > { %3010 = vst.msk [vmem:[%s5357_s6 + $0x90] sm:$0xff] %vm2991_vm7, %v2977_v13  ;;  %v2975_v58 = vmax.f32 %v2943_v7, 0.0  ;;  %v2946_v21 = vadd.f32 %v5341_v20, %v2907_v54  ;;  %v2905_v37 = vadd.f32 %v2828_v18, %v2689_v61  ;;  %v2694_v0 = vadd.f32 %v3769_v27, %v2462_v38  ;;  %v3804_v45 = vpop.f32.mrf.mxu0  ;;  %v5774_v13 = vld [vmem:[#allocation17_spill] sm:$0xff]  ;;  %v5775_v7 = vld [vmem:[#allocation42_spill] sm:$0xff] }
 0x217   : > { %v2625_v22 = vpop.f32.mrf.mxu1  ;;  %v2260_v54 = vadd.f32 %v5775_v7, %v5774_v13  ;;  %v2465_v27 = vadd.f32 %v5776_v19, %v2255_v15 }
 0x218   : > { %3008 = vst.msk [vmem:[%s5357_s6 + $0x80] sm:$0xff] %vm2991_vm7, %v2975_v58  ;;  %v2978_v2 = vmax.f32 %v2946_v21, 0.0  ;;  %v2944_v42 = vadd.f32 %v5341_v20, %v2905_v37  ;;  %v2910_v9 = vadd.f32 %v3803_v34, %v2694_v0  ;;  %v2692_v53 = vadd.f32 %v2625_v22, %v2460_v29  ;;  %v2844_v56 = vpop.f32.mrf.mxu0  ;;  %v5777_v58 = vld [vmem:[#allocation20_spill] sm:$0xff] }
 0x219   : > { %v3770_v4 = vpop.f32.mrf.mxu1  ;;  %v5778_v21 = vld [vmem:[#allocation44_spill] sm:$0xff]  ;;  %v2470_v22 = vadd.f32 %v5779_v36, %v2260_v54 }
 0x21a   : > { %3011 = vst.msk [vmem:[%s5357_s6 + $0x98] sm:$0xff] %vm2991_vm7, %v2978_v2  ;;  %v2976_v28 = vmax.f32 %v2944_v42, 0.0  ;;  %v2949_v16 = vadd.f32 %v5341_v20, %v2910_v9  ;;  %v2908_v44 = vadd.f32 %v2841_v41, %v2692_v53  ;;  %v2695_v33 = vadd.f32 %v3770_v4, %v2463_v31  ;;  %v3807_v12 = vpop.f32.mrf.mxu0  ;;  %v5780_v2 = vld [vmem:[#allocation25_spill] sm:$0xff]  ;;  %v5783_v4 = vld [vmem:[#allocation46_spill] sm:$0xff] }
 0x21b   : > { %v2628_v5 = vpop.f32.mrf.mxu1  ;;  %v2258_v37 = vadd.f32 %v5778_v21, %v5777_v58  ;;  %v2261_v42 = vadd.f32 %v5325_v32, %v5780_v2 }
 0x21c   : > { %3009 = vst.msk [vmem:[%s5357_s6 + $0x88] sm:$0xff] %vm2991_vm7, %v2976_v28  ;;  %v2981_v18 = vmax.f32 %v2949_v16, 0.0  ;;  %v2947_v55 = vadd.f32 %v5341_v20, %v2908_v44  ;;  %v2911_v17 = vadd.f32 %v3804_v45, %v2695_v33  ;;  %v2693_v1 = vadd.f32 %v2628_v5, %v2461_v49  ;;  %v2857_v26 = vpop.f32.mrf.mxu0 }
 0x21d   : > { %v3773_v6 = vpop.f32.mrf.mxu1  ;;  %v2468_v3 = vadd.f32 %v5781_v50, %v2258_v37  ;;  %v2259_v28 = vadd.f32 %v5783_v4, %v5782_v14 }
 0x21e   : > { %3014 = vst.msk [vmem:[%s5357_s6 + $0xb0] sm:$0xff] %vm2991_vm7, %v2981_v18  ;;  %v2979_v34 = vmax.f32 %v2947_v55, 0.0  ;;  %v2950_v46 = vadd.f32 %v5341_v20, %v2911_v17  ;;  %v2909_v38 = vadd.f32 %v2844_v56, %v2693_v1  ;;  %v2698_v48 = vadd.f32 %v3773_v6, %v2466_v63  ;;  %v3808_v8 = vpop.f32.mrf.mxu0  ;;  %v5784_v63 = vld [vmem:[#allocation43_spill] sm:$0xff]  ;;  %v5785_v17 = vld [vmem:[#allocation45_spill] sm:$0xff] }
 0x21f   : > { %v2641_v61 = vpop.f32.mrf.mxu1  ;;  %v2471_v39 = vadd.f32 %v5784_v63, %v2261_v42  ;;  %v2469_v1 = vadd.f32 %v5785_v17, %v2259_v28 }
 0x220   : > { %3012 = vst.msk [vmem:[%s5357_s6 + $0xa0] sm:$0xff] %vm2991_vm7, %v2979_v34  ;;  %v2982_v41 = vmax.f32 %v2950_v46, 0.0  ;;  %v2948_v24 = vadd.f32 %v5341_v20, %v2909_v38  ;;  %v2914_v29 = vadd.f32 %v3807_v12, %v2698_v48  ;;  %v2696_v35 = vadd.f32 %v2641_v61, %v2464_v57  ;;  %v2860_v43 = vpop.f32.mrf.mxu0 }
 0x221   : > { %v3774_v0 = vpop.f32.mrf.mxu1 }
 0x222   : > { %3015 = vst.msk [vmem:[%s5357_s6 + $0xb8] sm:$0xff] %vm2991_vm7, %v2982_v41  ;;  %v2980_v45 = vmax.f32 %v2948_v24, 0.0  ;;  %v2953_v59 = vadd.f32 %v5341_v20, %v2914_v29  ;;  %v2912_v31 = vadd.f32 %v2857_v26, %v2696_v35  ;;  %v2699_v40 = vadd.f32 %v3774_v0, %v2467_v23  ;;  %v3811_v60 = vpop.f32.mrf.mxu0 }
 0x223   : > { %v2644_v9 = vpop.f32.mrf.mxu1 }
 0x224   : > { %3013 = vst.msk [vmem:[%s5357_s6 + $0xa8] sm:$0xff] %vm2991_vm7, %v2980_v45  ;;  %v2985_v53 = vmax.f32 %v2953_v59, 0.0  ;;  %v2951_v56 = vadd.f32 %v5341_v20, %v2912_v31  ;;  %v2915_v10 = vadd.f32 %v3808_v8, %v2699_v40  ;;  %v2697_v49 = vadd.f32 %v2644_v9, %v2465_v27  ;;  %v2873_v44 = vpop.f32.mrf.mxu0 }
 0x225   : > { %v3777_v16 = vpop.f32.mrf.mxu1 }
 0x226   : > { %3018 = vst.msk [vmem:[%s5357_s6 + $0xd0] sm:$0xff] %vm2991_vm7, %v2985_v53  ;;  %v2983_v32 = vmax.f32 %v2951_v56, 0.0  ;;  %v2954_v33 = vadd.f32 %v5341_v20, %v2915_v10  ;;  %v2913_v12 = vadd.f32 %v2860_v43, %v2697_v49  ;;  %v2702_v51 = vadd.f32 %v3777_v16, %v2470_v22  ;;  %v3812_v62 = vpop.f32.mrf.mxu0 }
 0x227   : > { %v2657_v11 = vpop.f32.mrf.mxu1 }
 0x228   : > { %3016 = vst.msk [vmem:[%s5357_s6 + $0xc0] sm:$0xff] %vm2991_vm7, %v2983_v32  ;;  %v2986_v25 = vmax.f32 %v2954_v33, 0.0  ;;  %v2952_v5 = vadd.f32 %v5341_v20, %v2913_v12  ;;  %v2918_v18 = vadd.f32 %v3811_v60, %v2702_v51  ;;  %v2700_v55 = vadd.f32 %v2657_v11, %v2468_v3  ;;  %v2876_v8 = vpop.f32.mrf.mxu0 }
 0x229   : > { %v3778_v26 = vpop.f32.mrf.mxu1 }
 0x22a   : > { %3019 = vst.msk [vmem:[%s5357_s6 + $0xd8] sm:$0xff] %vm2991_vm7, %v2986_v25  ;;  %v2984_v57 = vmax.f32 %v2952_v5, 0.0  ;;  %v2957_v52 = vadd.f32 %v5341_v20, %v2918_v18  ;;  %v2916_v47 = vadd.f32 %v2873_v44, %v2700_v55  ;;  %v2703_v15 = vadd.f32 %v3778_v26, %v2471_v39 }
 0x22b   : > { %v2660_v6 = vpop.f32.mrf.mxu1 }
 0x22c   : > { %3017 = vst.msk [vmem:[%s5357_s6 + $0xc8] sm:$0xff] %vm2991_vm7, %v2984_v57  ;;  %v2989_v34 = vmax.f32 %v2957_v52, 0.0  ;;  %v2955_v46 = vadd.f32 %v5341_v20, %v2916_v47  ;;  %v2919_v38 = vadd.f32 %v3812_v62, %v2703_v15  ;;  %v2701_v48 = vadd.f32 %v2660_v6, %v2469_v1 }
 0x22e   : > { %3022 = vst.msk [vmem:[%s5357_s6 + $0xf0] sm:$0xff] %vm2991_vm7, %v2989_v34  ;;  %v2987_v30 = vmax.f32 %v2955_v46, 0.0  ;;  %v2958_v23 = vadd.f32 %v5341_v20, %v2919_v38  ;;  %v2917_v13 = vadd.f32 %v2876_v8, %v2701_v48 }
 0x230   : > { %3020 = vst.msk [vmem:[%s5357_s6 + $0xe0] sm:$0xff] %vm2991_vm7, %v2987_v30  ;;  %v2990_v7 = vmax.f32 %v2958_v23, 0.0  ;;  %v2956_v54 = vadd.f32 %v5341_v20, %v2917_v13 }
 0x232   : > { %3023 = vst.msk [vmem:[%s5357_s6 + $0xf8] sm:$0xff] %vm2991_vm7, %v2990_v7  ;;  %v2988_v61 = vmax.f32 %v2956_v54, 0.0 }
 0x234   : > { %3021 = vst.msk [vmem:[%s5357_s6 + $0xe8] sm:$0xff] %vm2991_vm7, %v2988_v61 }
 0x235   : > { %3897 = shalt.err (!%p3894_p3)
}
 0x236   : > { %s3898_s25 = scalar_lea.hbm %s5528_s11, 4096  ;;  %s3902_s28 = scalar_lea.hbm %s5581_s3, 8192 }
 0x237   : > { %p3899_p4 = scmp.ne.s32.totalorder %s5528_s11, %s3898_s25  ;;  %p3903_p9 = scmp.lt.s32.totalorder %s5528_s11, %s5581_s3 }
 0x238   : > { %p3904_p10 = scmp.lt.s32.totalorder %s3902_s28, %s3898_s25 }
 0x239   : > { %p3900_p7 = pnand %p3899_p4, %p4007_p5 }
 0x23a   : > { %p3905_p11 = por %p3904_p10, %p3903_p9 }
 0x23b   : > { %p3901_p8 = pneg %p3900_p7 }
 0x23d   : > { %p3906_p12 = pnand %p3905_p11, %p3901_p8 }
 0x23f   : > { %3909 = shalt.err (!%p3906_p12)
}
 0x240   : > { %s3947_s4 = smov 128   ;;  %s3948_s5 = smov 8  }
 0x241   : > { %3816 = dma.vmem_to_hbm [thread:$0]  (%p4007_p5), %s5530_s8, 4096, %s5528_s11, %s5538_s16, %s3947_s4, %s3947_s4, %s3948_s5  }
 0x242 PF: > { %p3822_p13 = scmp.ge.s32.totalorder %s3944_s15, 2  ;;  %s3053_s6 = sand.u32 1, %s3932_s12  }
 0x243   : > { %s3054_s7 = scalar_lea.sflag [#allocation3], %s3053_s6 }
 0x244   : > { %p3819_p0 = pnand %p3822_p13, %p4011_p6 }
 0x246   : > { %p3820_p1 = pneg %p3819_p0 }
 0x248   : > { %3927 = dma.done.wait (%p3820_p1), %s3054_s7, 4096  }
 0x249   : > { %3929 = vsyncadd (%p3820_p1), %s3054_s7, 4294963200  ;;  %p13_p2 = scmp.ge.s32.totalorder %s3994_s18, 4   ;;  %s5786_s12 = smov %s3936_s13 }
 0x24a   : > { %s5787_s13 = smov %s3940_s14  ;;  %s5788_s14 = smov %s4005_s21 }
 0x24b   : > { %s5789_s15 = smov %s3994_s18  ;;  %15 = sbr.rel (!%p13_p2) target bundleno = 3 (0x3), region = 75 }
 0x250   :  { %3059 = vsyncpa [#allocation3], 1 }
 0x251   :  { %3061 = vsyncpa [#allocation3 + $0x1], 1 }

</bundles_post_ra>
